<compile_context>
chip_gen: v6e
topology: v6e:2x2x1
jax: 0.10.0
libtpu: 0.0.40
codegen_flags: <defaults>
</compile_context>

<pallas_src>
import functools

import numpy as np

import jax
import jax.numpy as jnp
from jax.experimental import pallas as pl
from jax.experimental.pallas import tpu as pltpu


# ----------------------------------------------------------------------------
# Positional encoding (exact replica of the PyTorch helper, incl. its formula).
# ----------------------------------------------------------------------------
def positional_encoding(seq_len: int, embedding_dim: int) -> jnp.ndarray:
    pe = np.zeros((seq_len, embedding_dim), dtype=np.float64)
    for pos in range(seq_len):
        for i in range(0, embedding_dim, 2):
            pe[pos, i] = np.sin(pos / 10000.0 ** (2 * i / embedding_dim))
            pe[pos, i + 1] = np.cos(pos / 10000.0 ** (2 * (i + 1) / embedding_dim))
    return jnp.asarray(pe, dtype=jnp.float32)


# ----------------------------------------------------------------------------
# Generation-dependent tiling / VMEM-limit choices.
# ----------------------------------------------------------------------------
def _arch_params():
    """Returns (query_tile_cap, vmem_limit_bytes) for the local TPU generation."""
    try:
        kind = jax.devices()[0].device_kind.lower()
    except Exception:
        kind = ""
    if "v7" in kind:        # 256-wide MXU, only 64 MiB VMEM -> leave headroom
        return 256, 48 * 1024 * 1024
    if "v6" in kind:        # 256-wide MXU, 128 MiB VMEM
        return 256, 96 * 1024 * 1024
    if "v5" in kind:        # 128-deep MXU, 128 MiB VMEM
        return 128, 96 * 1024 * 1024
    return 128, 48 * 1024 * 1024    # unknown: conservative


def _const_spec(shape, single_buffer=True):
    """BlockSpec for a grid-invariant input (constant index_map).

    With single_buffer=True the second pipeline buffer is elided
    (pipeline_mode=pl.Buffered(1)); falls back silently on older JAX.
    """
    index_map = lambda *_: (0,) * len(shape)
    if single_buffer:
        try:
            return pl.BlockSpec(shape, index_map, pipeline_mode=pl.Buffered(1))
        except Exception:
            pass
    return pl.BlockSpec(shape, index_map)


# ----------------------------------------------------------------------------
# Kernel A: fused Q/K/V projection.
#   grid = (batch, row-tiles); outputs stored in bf16 (MXU input dtype).
#   Q is pre-scaled by 1/sqrt(q_dim) (fold the score scaling into Q).
# ----------------------------------------------------------------------------
def _qkv_proj_kernel(x_ref, wq_ref, bq_ref, wk_ref, bk_ref, wv_ref, bv_ref,
                     q_ref, k_ref, v_ref, *, q_dim):
    x_bf = x_ref[0].astype(jnp.bfloat16)                              # (tr, E)
    inv_scale = jnp.float32(1.0 / (q_dim ** 0.5))
    q = (jnp.dot(x_bf, wq_ref[...], preferred_element_type=jnp.float32)
         + bq_ref[...]) * inv_scale
    k = jnp.dot(x_bf, wk_ref[...], preferred_element_type=jnp.float32) + bk_ref[...]
    v = jnp.dot(x_bf, wv_ref[...], preferred_element_type=jnp.float32) + bv_ref[...]
    q_ref[0] = q.astype(q_ref.dtype)
    k_ref[0] = k.astype(k_ref.dtype)
    v_ref[0] = v.astype(v_ref.dtype)


def qkv_projection(x, wq, bq, wk, bk, wv, bv, *, q_dim, row_cap, vmem_limit):
    B, S, E = x.shape
    HQ, HV = wq.shape[1], wv.shape[1]
    tr = min(S, row_cap)
    assert S % tr == 0, "sequence length must be divisible by the row tile"
    nr = S // tr
    kernel = functools.partial(_qkv_proj_kernel, q_dim=q_dim)

    def call(single_buffer):
        return pl.pallas_call(
            kernel,
            out_shape=(jax.ShapeDtypeStruct((B, S, HQ), jnp.bfloat16),
                       jax.ShapeDtypeStruct((B, S, HQ), jnp.bfloat16),
                       jax.ShapeDtypeStruct((B, S, HV), jnp.bfloat16)),
            grid=(B, nr),
            in_specs=[
                pl.BlockSpec((1, tr, E), lambda b, r: (b, r, 0)),
                _const_spec((E, HQ), single_buffer), _const_spec((1, HQ), single_buffer),
                _const_spec((E, HQ), single_buffer), _const_spec((1, HQ), single_buffer),
                _const_spec((E, HV), single_buffer), _const_spec((1, HV), single_buffer),
            ],
            out_specs=(pl.BlockSpec((1, tr, HQ), lambda b, r: (b, r, 0)),
                       pl.BlockSpec((1, tr, HQ), lambda b, r: (b, r, 0)),
                       pl.BlockSpec((1, tr, HV), lambda b, r: (b, r, 0))),
            compiler_params=pltpu.CompilerParams(
                dimension_semantics=("parallel", "parallel"),
                vmem_limit_bytes=vmem_limit),
        )(x, wq, bq, wk, bk, wv, bv)

    try:
        return call(True)
    except Exception:
        return call(False)          # older JAX without pipeline_mode support


# ----------------------------------------------------------------------------
# Kernel B: fused attention + residual/LN + FFN + residual/LN.
#   grid = (batch, query-tiles)
#   pad_ref : (1, 1, S)   f32 additive bias (0 or -1e9 at padded key positions)
#   xq_ref  : (1, tq, E)  f32 query rows (residual path)
#   q_ref   : (1, tq, HQ) bf16 pre-scaled query projection
#   k_ref   : (1, S,  HQ) bf16 key projection (full sequence)
#   v_ref   : (1, S,  HV) bf16 value projection (full sequence)
# ----------------------------------------------------------------------------
def _attn_ffn_kernel(pad_ref, xq_ref, q_ref, k_ref, v_ref,
                     wo_ref, bo_ref, g1_ref, be1_ref,
                     w1_ref, b1_ref, w2_ref, b2_ref, g2_ref, be2_ref,
                     out_ref, *, num_heads, q_dim, v_dim, tq, masking):
    xq = xq_ref[0]                                   # (tq, E) f32
    q_all = q_ref[0]                                 # (tq, H*Qd) bf16
    k_all = k_ref[0]                                 # (S, H*Qd) bf16
    v_all = v_ref[0]                                 # (S, H*Vd) bf16
    pad_bias = pad_ref[0]                            # (1, S) f32, 0 or -1e9
    S = k_all.shape[0]
    E = xq.shape[1]

    if masking:  # causal mask (unused for BERT; kept for module parity)
        q_start = pl.program_id(1) * tq
        rows = jax.lax.broadcasted_iota(jnp.int32, (tq, S), 0) + q_start
        cols = jax.lax.broadcasted_iota(jnp.int32, (tq, S), 1)
        causal = cols > rows

    # TODO(synk): for real BERT head counts (H>=12) a lax.fori_loop over heads
    # (or a heads grid axis) would bound vreg live ranges; static unroll is
    # fine at the small demo head count.
    attn = jnp.zeros((tq, E), jnp.float32)
    for h in range(num_heads):
        qh = q_all[:, h * q_dim:(h + 1) * q_dim]
        kh = k_all[:, h * q_dim:(h + 1) * q_dim]
        vh = v_all[:, h * v_dim:(h + 1) * v_dim]

        # scores = (q/sqrt(d)) . k  (contract last dims -- no explicit transpose)
        s = jax.lax.dot_general(qh, kh, (((1,), (1,)), ((), ())),
                                preferred_element_type=jnp.float32)   # (tq, S)
        if masking:
            s = jnp.where(causal, -jnp.inf, s)
        s = s + pad_bias                                              # additive pad mask

        # numerically-stable softmax; normalization applied to ctx (tq,Vd),
        # not to p (tq,S), via the EUP approx reciprocal.
        m = jnp.max(s, axis=-1, keepdims=True)
        p = jnp.exp(s - m)                                            # unnormalized
        denom = jnp.sum(p, axis=-1, keepdims=True)
        ctx = jnp.dot(p.astype(jnp.bfloat16), vh,
                      preferred_element_type=jnp.float32)             # (tq, Vd)
        ctx = ctx * pl.reciprocal(denom, approx=True)

        # concat-free output projection: accumulate ctx_h @ Wo[h*Vd:(h+1)*Vd, :]
        attn = attn + jnp.dot(ctx.astype(jnp.bfloat16),
                              wo_ref[h * v_dim:(h + 1) * v_dim, :],
                              preferred_element_type=jnp.float32)
    attn = attn + bo_ref[...]

    # --- residual + LayerNorm (post-attention) -------------------------------
    # TODO(synk): nn.Dropout is treated as identity (inference semantics).
    h1 = xq + attn
    mu1 = jnp.mean(h1, axis=-1, keepdims=True)
    var1 = jnp.mean(jnp.square(h1 - mu1), axis=-1, keepdims=True)
    h1 = (h1 - mu1) * jax.lax.rsqrt(var1 + 1e-5) * g1_ref[...] + be1_ref[...]

    # --- feed-forward: Linear -> ReLU -> Linear (bf16 MXU, f32 accumulate) ----
    f = jnp.dot(h1.astype(jnp.bfloat16), w1_ref[...],
                preferred_element_type=jnp.float32) + b1_ref[...]
    f = jnp.maximum(f, 0.0)
    f = jnp.dot(f.astype(jnp.bfloat16), w2_ref[...],
                preferred_element_type=jnp.float32) + b2_ref[...]

    # --- residual + LayerNorm (post-FFN) --------------------------------------
    h2 = h1 + f
    mu2 = jnp.mean(h2, axis=-1, keepdims=True)
    var2 = jnp.mean(jnp.square(h2 - mu2), axis=-1, keepdims=True)
    h2 = (h2 - mu2) * jax.lax.rsqrt(var2 + 1e-5) * g2_ref[...] + be2_ref[...]

    out_ref[0] = h2.astype(out_ref.dtype)


def encoder_layer_forward(x, pad_bias, layer_params, *, num_heads, q_dim, v_dim,
                          masking, tq_cap, vmem_limit):
    """One transformer-encoder layer. x: (B,S,E) f32; pad_bias: (B,1,S) f32."""
    (wq, bq, wk, bk, wv, bv, wo, bo,
     g1, be1, w1, b1, w2, b2, g2, be2) = layer_params
    B, S, E = x.shape
    tq = min(S, tq_cap)
    assert S % tq == 0, "sequence length must be divisible by the query tile"
    nq = S // tq
    HQ, HV, HID = wq.shape[1], wv.shape[1], w1.shape[1]

    # K/V (and Q) computed once per batch element -- never recomputed per q-tile.
    q_all, k_all, v_all = qkv_projection(x, wq, bq, wk, bk, wv, bv,
                                         q_dim=q_dim, row_cap=tq_cap,
                                         vmem_limit=vmem_limit)

    kernel = functools.partial(_attn_ffn_kernel, num_heads=num_heads,
                               q_dim=q_dim, v_dim=v_dim, tq=tq, masking=masking)

    def call(single_buffer):
        cs = lambda shp: _const_spec(shp, single_buffer)
        return pl.pallas_call(
            kernel,
            out_shape=jax.ShapeDtypeStruct((B, S, E), jnp.float32),
            grid=(B, nq),
            in_specs=[
                pl.BlockSpec((1, 1, S), lambda b, qi: (b, 0, 0)),    # pad bias
                pl.BlockSpec((1, tq, E), lambda b, qi: (b, qi, 0)),  # query rows
                pl.BlockSpec((1, tq, HQ), lambda b, qi: (b, qi, 0)),  # Q tile
                pl.BlockSpec((1, S, HQ), lambda b, qi: (b, 0, 0)),   # K (full seq)
                pl.BlockSpec((1, S, HV), lambda b, qi: (b, 0, 0)),   # V (full seq)
                cs((HV, E)), cs((1, E)),                             # Wo, bo
                cs((1, E)), cs((1, E)),                              # LN1 gamma, beta
                cs((E, HID)), cs((1, HID)),                          # FFN W1, b1
                cs((HID, E)), cs((1, E)),                            # FFN W2, b2
                cs((1, E)), cs((1, E)),                              # LN2 gamma, beta
            ],
            out_specs=pl.BlockSpec((1, tq, E), lambda b, qi: (b, qi, 0)),
            compiler_params=pltpu.CompilerParams(
                dimension_semantics=("parallel", "parallel"),
                vmem_limit_bytes=vmem_limit),
        )(pad_bias, x, q_all, k_all, v_all,
          wo, bo, g1, be1, w1, b1, w2, b2, g2, be2)

    try:
        return call(True)
    except Exception:
        return call(False)          # older JAX without pipeline_mode support


# ----------------------------------------------------------------------------
# Full Bert forward (embeddings in the wrapper, encoder layers in Pallas).
# ----------------------------------------------------------------------------
def prepare_bert_params(params):
    """One-time bf16 conversion of the big matmul weights (no per-call casts)."""
    tok_tab, seg_tab, layers = params
    bf = lambda a: a.astype(jnp.bfloat16)
    new_layers = []
    for (wq, bq, wk, bk, wv, bv, wo, bo,
         g1, be1, w1, b1, w2, b2, g2, be2) in layers:
        new_layers.append((bf(wq), bq, bf(wk), bk, bf(wv), bv, bf(wo), bo,
                           g1, be1, bf(w1), b1, bf(w2), b2, g2, be2))
    return tok_tab, seg_tab, new_layers


def bert_forward(token_ids, segment_ids, prepared_params, *, num_heads, q_dim, v_dim):
    tok_tab, seg_tab, layers = prepared_params
    B, S = token_ids.shape
    E = tok_tab.shape[1]
    pe = positional_encoding(S, E)
    # TODO(synk): nn.Embedding gathers are done with array indexing in the
    # wrapper (dynamic row gather has no clean small-scale BlockSpec form).
    x = tok_tab[token_ids] + seg_tab[segment_ids] + pe     # Bert.forward
    x = x + pe                             # TransformerEncoder adds PE again (as in the spec)
    # additive pad-mask bias, computed once per forward
    pad_bias = jnp.where(token_ids == 0, jnp.float32(-1e9),
                         jnp.float32(0.0)).reshape(B, 1, S)
    tq_cap, vmem_limit = _arch_params()
    for lp in layers:
        x = encoder_layer_forward(x, pad_bias, lp, num_heads=num_heads,
                                  q_dim=q_dim, v_dim=v_dim, masking=False,
                                  tq_cap=tq_cap, vmem_limit=vmem_limit)
    return x


# ----------------------------------------------------------------------------
# Pure-JAX reference (f32, HIGHEST precision) replicating the PyTorch forward.
# ----------------------------------------------------------------------------
_HI = jax.lax.Precision.HIGHEST


def _layer_norm_ref(x, g, b, eps=1e-5):
    mu = jnp.mean(x, axis=-1, keepdims=True)
    var = jnp.mean(jnp.square(x - mu), axis=-1, keepdims=True)
    return (x - mu) / jnp.sqrt(var + eps) * g + b


def _encoder_layer_ref(x, pad_mask, lp, num_heads, q_dim, v_dim):
    (wq, bq, wk, bk, wv, bv, wo, bo,
     g1, be1, w1, b1, w2, b2, g2, be2) = lp
    heads = []
    for h in range(num_heads):
        qs = slice(h * q_dim, (h + 1) * q_dim)
        vs = slice(h * v_dim, (h + 1) * v_dim)
        qh = jnp.dot(x, wq[:, qs], precision=_HI) + bq[0, qs]
        kh = jnp.dot(x, wk[:, qs], precision=_HI) + bk[0, qs]
        vh = jnp.dot(x, wv[:, vs], precision=_HI) + bv[0, vs]
        dot = jnp.einsum("bqd,bkd->bqk", qh, kh, precision=_HI) / (q_dim ** 0.5)
        pm = jnp.broadcast_to(pad_mask[:, None, :], dot.shape)
        dot = jnp.where(pm, -1e9, dot)
        p = jax.nn.softmax(dot, axis=-1)
        heads.append(jnp.einsum("bqk,bkd->bqd", p, vh, precision=_HI))
    attn = jnp.dot(jnp.concatenate(heads, -1), wo, precision=_HI) + bo[0]
    h1 = _layer_norm_ref(x + attn, g1, be1)
    f = jnp.maximum(jnp.dot(h1, w1, precision=_HI) + b1[0], 0.0)
    f = jnp.dot(f, w2, precision=_HI) + b2[0]
    return _layer_norm_ref(h1 + f, g2, be2)


def bert_reference(token_ids, segment_ids, params, *, num_heads, q_dim, v_dim):
    tok_tab, seg_tab, layers = params
    S = token_ids.shape[1]
    E = tok_tab.shape[1]
    pad_mask = token_ids == 0
    pe = positional_encoding(S, E)
    x = tok_tab[token_ids] + seg_tab[segment_ids] + pe
    x = x + pe
    for lp in layers:
        x = _encoder_layer_ref(x, pad_mask, lp, num_heads, q_dim, v_dim)
    return x


# ----------------------------------------------------------------------------
# Parameter construction (fused-head storage; nn.Linear-equivalent semantics).
# ----------------------------------------------------------------------------
def init_layer_params(key, E, H, Qd, Vd, hidden):
    ks = jax.random.split(key, 16)
    s = 0.08
    n = lambda k, shp: s * jax.random.normal(k, shp, jnp.float32)
    wq, bq = n(ks[0], (E, H * Qd)), n(ks[1], (1, H * Qd))
    wk, bk = n(ks[2], (E, H * Qd)), n(ks[3], (1, H * Qd))
    wv, bv = n(ks[4], (E, H * Vd)), n(ks[5], (1, H * Vd))
    wo, bo = n(ks[6], (H * Vd, E)), n(ks[7], (1, E))
    g1 = 1.0 + 0.1 * jax.random.normal(ks[8], (1, E), jnp.float32)
    be1 = 0.05 * jax.random.normal(ks[9], (1, E), jnp.float32)
    w1, b1 = n(ks[10], (E, hidden)), n(ks[11], (1, hidden))
    w2, b2 = n(ks[12], (hidden, E)), n(ks[13], (1, E))
    g2 = 1.0 + 0.1 * jax.random.normal(ks[14], (1, E), jnp.float32)
    be2 = 0.05 * jax.random.normal(ks[15], (1, E), jnp.float32)
    return (wq, bq, wk, bk, wv, bv, wo, bo, g1, be1, w1, b1, w2, b2, g2, be2)


if __name__ == "__main__":
    # Small shapes consistent with the module.
    B, S = 2, 8                       # batch, sequence
    E, H = 32, 4                      # embedding_dim, num_heads
    Qd = Vd = E // H                  # query_dim = value_dim = 8
    HIDDEN = 64                       # feed-forward hidden_dim
    NUM_LAYERS = 2                    # num_encoder_layers
    VOCAB = 32                        # vocab_size

    root = jax.random.PRNGKey(0)
    k_emb, k_seg, k_layers, k_tok, k_seglab = jax.random.split(root, 5)

    tok_tab = 0.5 * jax.random.normal(k_emb, (VOCAB, E), jnp.float32)
    tok_tab = tok_tab.at[0].set(0.0)          # padding_idx=0
    seg_tab = 0.5 * jax.random.normal(k_seg, (3, E), jnp.float32)
    seg_tab = seg_tab.at[0].set(0.0)          # padding_idx=0

    layers = [init_layer_params(k, E, H, Qd, Vd, HIDDEN)
              for k in jax.random.split(k_layers, NUM_LAYERS)]
    params = (tok_tab, seg_tab, layers)
    prepared = prepare_bert_params(params)    # one-time bf16 weight conversion

    token_ids = jax.random.randint(k_tok, (B, S), 1, VOCAB)
    token_ids = token_ids.at[1, -2:].set(0)   # pad the last 2 tokens of batch 1
    segment_ids = jax.random.randint(k_seglab, (B, S), 1, 3)
    segment_ids = jnp.where(token_ids == 0, 0, segment_ids)

    out = bert_forward(token_ids, segment_ids, prepared,
                       num_heads=H, q_dim=Qd, v_dim=Vd)
    out = jax.block_until_ready(out)

    ref = bert_reference(token_ids, segment_ids, params,
                         num_heads=H, q_dim=Qd, v_dim=Vd)
    assert out.shape == (B, S, E)
    # Tolerance reflects bf16 MXU inputs (f32 accumulate) vs. the f32 reference.
    max_err = float(jnp.max(jnp.abs(out - ref)))
    assert jnp.allclose(out, ref, atol=5e-2, rtol=5e-2), \
        f"mismatch vs reference (max abs err {max_err})"
    print("KERNEL_OK")
</pallas_src>

<mosaic_0001>
module attributes {stable_mosaic.version = 11 : i64} {
  func.func @_qkv_proj_kernel(%arg0: i32, %arg1: i32, %arg2: memref<1x8x32xf32, #tpu.memory_space<vmem>>, %arg3: memref<32x32xbf16, #tpu.memory_space<vmem>>, %arg4: memref<1x32xf32, #tpu.memory_space<vmem>>, %arg5: memref<32x32xbf16, #tpu.memory_space<vmem>>, %arg6: memref<1x32xf32, #tpu.memory_space<vmem>>, %arg7: memref<32x32xbf16, #tpu.memory_space<vmem>>, %arg8: memref<1x32xf32, #tpu.memory_space<vmem>>, %arg9: memref<1x8x32xbf16, #tpu.memory_space<vmem>>, %arg10: memref<1x8x32xbf16, #tpu.memory_space<vmem>>, %arg11: memref<1x8x32xbf16, #tpu.memory_space<vmem>>) attributes {dimension_semantics = [#tpu.dimension_semantics<parallel>, #tpu.dimension_semantics<parallel>], iteration_bounds = array<i64: 2, 1>, scalar_prefetch = 0 : i64, scratch_operands = 0 : i64, tpu.core_type = #tpu.core_type<tc>, window_params = [{transform_indices = @transform_0, window_bounds = array<i64: 1, 8, 32>}, {pipeline_mode = #tpu.pipeline_mode<synchronous>, transform_indices = @transform_1, window_bounds = array<i64: 32, 32>}, {pipeline_mode = #tpu.pipeline_mode<synchronous>, transform_indices = @transform_2, window_bounds = array<i64: 1, 32>}, {pipeline_mode = #tpu.pipeline_mode<synchronous>, transform_indices = @transform_3, window_bounds = array<i64: 32, 32>}, {pipeline_mode = #tpu.pipeline_mode<synchronous>, transform_indices = @transform_4, window_bounds = array<i64: 1, 32>}, {pipeline_mode = #tpu.pipeline_mode<synchronous>, transform_indices = @transform_5, window_bounds = array<i64: 32, 32>}, {pipeline_mode = #tpu.pipeline_mode<synchronous>, transform_indices = @transform_6, window_bounds = array<i64: 1, 32>}, {transform_indices = @transform_7, window_bounds = array<i64: 1, 8, 32>}, {transform_indices = @transform_8, window_bounds = array<i64: 1, 8, 32>}, {transform_indices = @transform_9, window_bounds = array<i64: 1, 8, 32>}]} {
    %c0 = arith.constant 0 : index
    %c0_0 = arith.constant 0 : index
    %c0_1 = arith.constant 0 : index
    %0 = vector.load %arg2[%c0, %c0_0, %c0_1] : memref<1x8x32xf32, #tpu.memory_space<vmem>>, vector<1x8x32xf32>
    %1 = vector.shape_cast %0 : vector<1x8x32xf32> to vector<8x32xf32>
    %2 = arith.truncf %1 : vector<8x32xf32> to vector<8x32xbf16>
    %c0_2 = arith.constant 0 : index
    %c0_3 = arith.constant 0 : index
    %3 = vector.load %arg3[%c0_2, %c0_3] : memref<32x32xbf16, #tpu.memory_space<vmem>>, vector<32x32xbf16>
    %cst = arith.constant dense<0.000000e+00> : vector<8x32xf32>
    %4 = tpu.matmul %2, %3, %cst {dimension_numbers = #tpu.dot_dimension_numbers<[1], [0], [0], [1], [0, 0, 1, 1], [], []>} : vector<8x32xbf16>, vector<32x32xbf16>, vector<8x32xf32> -> vector<8x32xf32>
    %c0_4 = arith.constant 0 : index
    %c0_5 = arith.constant 0 : index
    %5 = vector.load %arg4[%c0_4, %c0_5] : memref<1x32xf32, #tpu.memory_space<vmem>>, vector<1x32xf32>
    %6 = vector.broadcast %5 : vector<1x32xf32> to vector<8x32xf32>
    %7 = arith.addf %4, %6 : vector<8x32xf32>
    %cst_6 = arith.constant 0.353553385 : f32
    %8 = vector.broadcast %cst_6 : f32 to vector<8x32xf32>
    %9 = arith.mulf %7, %8 : vector<8x32xf32>
    %c0_7 = arith.constant 0 : index
    %c0_8 = arith.constant 0 : index
    %10 = vector.load %arg5[%c0_7, %c0_8] : memref<32x32xbf16, #tpu.memory_space<vmem>>, vector<32x32xbf16>
    %cst_9 = arith.constant dense<0.000000e+00> : vector<8x32xf32>
    %11 = tpu.matmul %2, %10, %cst_9 {dimension_numbers = #tpu.dot_dimension_numbers<[1], [0], [0], [1], [0, 0, 1, 1], [], []>} : vector<8x32xbf16>, vector<32x32xbf16>, vector<8x32xf32> -> vector<8x32xf32>
    %c0_10 = arith.constant 0 : index
    %c0_11 = arith.constant 0 : index
    %12 = vector.load %arg6[%c0_10, %c0_11] : memref<1x32xf32, #tpu.memory_space<vmem>>, vector<1x32xf32>
    %13 = vector.broadcast %12 : vector<1x32xf32> to vector<8x32xf32>
    %14 = arith.addf %11, %13 : vector<8x32xf32>
    %c0_12 = arith.constant 0 : index
    %c0_13 = arith.constant 0 : index
    %15 = vector.load %arg7[%c0_12, %c0_13] : memref<32x32xbf16, #tpu.memory_space<vmem>>, vector<32x32xbf16>
    %cst_14 = arith.constant dense<0.000000e+00> : vector<8x32xf32>
    %16 = tpu.matmul %2, %15, %cst_14 {dimension_numbers = #tpu.dot_dimension_numbers<[1], [0], [0], [1], [0, 0, 1, 1], [], []>} : vector<8x32xbf16>, vector<32x32xbf16>, vector<8x32xf32> -> vector<8x32xf32>
    %c0_15 = arith.constant 0 : index
    %c0_16 = arith.constant 0 : index
    %17 = vector.load %arg8[%c0_15, %c0_16] : memref<1x32xf32, #tpu.memory_space<vmem>>, vector<1x32xf32>
    %18 = vector.broadcast %17 : vector<1x32xf32> to vector<8x32xf32>
    %19 = arith.addf %16, %18 : vector<8x32xf32>
    %20 = arith.truncf %9 : vector<8x32xf32> to vector<8x32xbf16>
    %c0_17 = arith.constant 0 : index
    %c0_18 = arith.constant 0 : index
    %c0_19 = arith.constant 0 : index
    %21 = vector.load %arg9[%c0_17, %c0_18, %c0_19] : memref<1x8x32xbf16, #tpu.memory_space<vmem>>, vector<1x8x32xbf16>
    %22 = vector.shape_cast %21 : vector<1x8x32xbf16> to vector<8x32xbf16>
    %23 = vector.shape_cast %20 : vector<8x32xbf16> to vector<1x8x32xbf16>
    tpu.vector_store %arg9[%c0_17, %c0_18, %c0_19], %23 {strides = array<i32>} : memref<1x8x32xbf16, #tpu.memory_space<vmem>>, vector<1x8x32xbf16>,
    %24 = arith.truncf %14 : vector<8x32xf32> to vector<8x32xbf16>
    %c0_20 = arith.constant 0 : index
    %c0_21 = arith.constant 0 : index
    %c0_22 = arith.constant 0 : index
    %25 = vector.load %arg10[%c0_20, %c0_21, %c0_22] : memref<1x8x32xbf16, #tpu.memory_space<vmem>>, vector<1x8x32xbf16>
    %26 = vector.shape_cast %25 : vector<1x8x32xbf16> to vector<8x32xbf16>
    %27 = vector.shape_cast %24 : vector<8x32xbf16> to vector<1x8x32xbf16>
    tpu.vector_store %arg10[%c0_20, %c0_21, %c0_22], %27 {strides = array<i32>} : memref<1x8x32xbf16, #tpu.memory_space<vmem>>, vector<1x8x32xbf16>,
    %28 = arith.truncf %19 : vector<8x32xf32> to vector<8x32xbf16>
    %c0_23 = arith.constant 0 : index
    %c0_24 = arith.constant 0 : index
    %c0_25 = arith.constant 0 : index
    %29 = vector.load %arg11[%c0_23, %c0_24, %c0_25] : memref<1x8x32xbf16, #tpu.memory_space<vmem>>, vector<1x8x32xbf16>
    %30 = vector.shape_cast %29 : vector<1x8x32xbf16> to vector<8x32xbf16>
    %31 = vector.shape_cast %28 : vector<8x32xbf16> to vector<1x8x32xbf16>
    tpu.vector_store %arg11[%c0_23, %c0_24, %c0_25], %31 {strides = array<i32>} : memref<1x8x32xbf16, #tpu.memory_space<vmem>>, vector<1x8x32xbf16>,
    return
  }
  func.func @transform_0(%arg0: i32, %arg1: i32) -> (i32, i32, i32) {
    %c0_i32 = arith.constant 0 : i32
    %c0_i32_0 = arith.constant 0 : i32
    return %arg0, %arg1, %c0_i32 : i32, i32, i32
  }
  func.func @transform_1(%arg0: i32, %arg1: i32) -> (i32, i32) {
    %c0_i32 = arith.constant 0 : i32
    %c0_i32_0 = arith.constant 0 : i32
    %c0_i32_1 = arith.constant 0 : i32
    return %c0_i32, %c0_i32_0 : i32, i32
  }
  func.func @transform_2(%arg0: i32, %arg1: i32) -> (i32, i32) {
    %c0_i32 = arith.constant 0 : i32
    %c0_i32_0 = arith.constant 0 : i32
    %c0_i32_1 = arith.constant 0 : i32
    return %c0_i32, %c0_i32_0 : i32, i32
  }
  func.func @transform_3(%arg0: i32, %arg1: i32) -> (i32, i32) {
    %c0_i32 = arith.constant 0 : i32
    %c0_i32_0 = arith.constant 0 : i32
    %c0_i32_1 = arith.constant 0 : i32
    return %c0_i32, %c0_i32_0 : i32, i32
  }
  func.func @transform_4(%arg0: i32, %arg1: i32) -> (i32, i32) {
    %c0_i32 = arith.constant 0 : i32
    %c0_i32_0 = arith.constant 0 : i32
    %c0_i32_1 = arith.constant 0 : i32
    return %c0_i32, %c0_i32_0 : i32, i32
  }
  func.func @transform_5(%arg0: i32, %arg1: i32) -> (i32, i32) {
    %c0_i32 = arith.constant 0 : i32
    %c0_i32_0 = arith.constant 0 : i32
    %c0_i32_1 = arith.constant 0 : i32
    return %c0_i32, %c0_i32_0 : i32, i32
  }
  func.func @transform_6(%arg0: i32, %arg1: i32) -> (i32, i32) {
    %c0_i32 = arith.constant 0 : i32
    %c0_i32_0 = arith.constant 0 : i32
    %c0_i32_1 = arith.constant 0 : i32
    return %c0_i32, %c0_i32_0 : i32, i32
  }
  func.func @transform_7(%arg0: i32, %arg1: i32) -> (i32, i32, i32) {
    %c0_i32 = arith.constant 0 : i32
    %c0_i32_0 = arith.constant 0 : i32
    return %arg0, %arg1, %c0_i32 : i32, i32, i32
  }
  func.func @transform_8(%arg0: i32, %arg1: i32) -> (i32, i32, i32) {
    %c0_i32 = arith.constant 0 : i32
    %c0_i32_0 = arith.constant 0 : i32
    return %arg0, %arg1, %c0_i32 : i32, i32, i32
  }
  func.func @transform_9(%arg0: i32, %arg1: i32) -> (i32, i32, i32) {
    %c0_i32 = arith.constant 0 : i32
    %c0_i32_0 = arith.constant 0 : i32
    return %arg0, %arg1, %c0_i32 : i32, i32, i32
  }
}

module attributes {stable_mosaic.version = 11 : i64} {
  func.func @_qkv_proj_kernel(%arg0: i32, %arg1: i32, %arg2: memref<1x8x32xf32, #tpu.memory_space<vmem>>, %arg3: memref<32x32xbf16, #tpu.memory_space<vmem>>, %arg4: memref<1x32xf32, #tpu.memory_space<vmem>>, %arg5: memref<32x32xbf16, #tpu.memory_space<vmem>>, %arg6: memref<1x32xf32, #tpu.memory_space<vmem>>, %arg7: memref<32x32xbf16, #tpu.memory_space<vmem>>, %arg8: memref<1x32xf32, #tpu.memory_space<vmem>>, %arg9: memref<1x8x32xbf16, #tpu.memory_space<vmem>>, %arg10: memref<1x8x32xbf16, #tpu.memory_space<vmem>>, %arg11: memref<1x8x32xbf16, #tpu.memory_space<vmem>>) attributes {dimension_semantics = [#tpu.dimension_semantics<parallel>, #tpu.dimension_semantics<parallel>], iteration_bounds = array<i64: 2, 1>, scalar_prefetch = 0 : i64, scratch_operands = 0 : i64, tpu.core_type = #tpu.core_type<tc>, window_params = [{transform_indices = @transform_0, window_bounds = array<i64: 1, 8, 32>}, {pipeline_mode = #tpu.pipeline_mode<synchronous>, transform_indices = @transform_1, window_bounds = array<i64: 32, 32>}, {pipeline_mode = #tpu.pipeline_mode<synchronous>, transform_indices = @transform_2, window_bounds = array<i64: 1, 32>}, {pipeline_mode = #tpu.pipeline_mode<synchronous>, transform_indices = @transform_3, window_bounds = array<i64: 32, 32>}, {pipeline_mode = #tpu.pipeline_mode<synchronous>, transform_indices = @transform_4, window_bounds = array<i64: 1, 32>}, {pipeline_mode = #tpu.pipeline_mode<synchronous>, transform_indices = @transform_5, window_bounds = array<i64: 32, 32>}, {pipeline_mode = #tpu.pipeline_mode<synchronous>, transform_indices = @transform_6, window_bounds = array<i64: 1, 32>}, {transform_indices = @transform_7, window_bounds = array<i64: 1, 8, 32>}, {transform_indices = @transform_8, window_bounds = array<i64: 1, 8, 32>}, {transform_indices = @transform_9, window_bounds = array<i64: 1, 8, 32>}]} {
    %c0 = arith.constant 0 : index
    %c0_0 = arith.constant 0 : index
    %c0_1 = arith.constant 0 : index
    %0 = vector.load %arg2[%c0, %c0_0, %c0_1] : memref<1x8x32xf32, #tpu.memory_space<vmem>>, vector<1x8x32xf32>
    %1 = vector.shape_cast %0 : vector<1x8x32xf32> to vector<8x32xf32>
    %2 = arith.truncf %1 : vector<8x32xf32> to vector<8x32xbf16>
    %c0_2 = arith.constant 0 : index
    %c0_3 = arith.constant 0 : index
    %3 = vector.load %arg3[%c0_2, %c0_3] : memref<32x32xbf16, #tpu.memory_space<vmem>>, vector<32x32xbf16>
    %cst = arith.constant dense<0.000000e+00> : vector<8x32xf32>
    %4 = tpu.matmul %2, %3, %cst {dimension_numbers = #tpu.dot_dimension_numbers<[1], [0], [0], [1], [0, 0, 1, 1], [], []>} : vector<8x32xbf16>, vector<32x32xbf16>, vector<8x32xf32> -> vector<8x32xf32>
    %c0_4 = arith.constant 0 : index
    %c0_5 = arith.constant 0 : index
    %5 = vector.load %arg4[%c0_4, %c0_5] : memref<1x32xf32, #tpu.memory_space<vmem>>, vector<1x32xf32>
    %6 = vector.broadcast %5 : vector<1x32xf32> to vector<8x32xf32>
    %7 = arith.addf %4, %6 : vector<8x32xf32>
    %cst_6 = arith.constant 0.353553385 : f32
    %8 = vector.broadcast %cst_6 : f32 to vector<8x32xf32>
    %9 = arith.mulf %7, %8 : vector<8x32xf32>
    %c0_7 = arith.constant 0 : index
    %c0_8 = arith.constant 0 : index
    %10 = vector.load %arg5[%c0_7, %c0_8] : memref<32x32xbf16, #tpu.memory_space<vmem>>, vector<32x32xbf16>
    %cst_9 = arith.constant dense<0.000000e+00> : vector<8x32xf32>
    %11 = tpu.matmul %2, %10, %cst_9 {dimension_numbers = #tpu.dot_dimension_numbers<[1], [0], [0], [1], [0, 0, 1, 1], [], []>} : vector<8x32xbf16>, vector<32x32xbf16>, vector<8x32xf32> -> vector<8x32xf32>
    %c0_10 = arith.constant 0 : index
    %c0_11 = arith.constant 0 : index
    %12 = vector.load %arg6[%c0_10, %c0_11] : memref<1x32xf32, #tpu.memory_space<vmem>>, vector<1x32xf32>
    %13 = vector.broadcast %12 : vector<1x32xf32> to vector<8x32xf32>
    %14 = arith.addf %11, %13 : vector<8x32xf32>
    %c0_12 = arith.constant 0 : index
    %c0_13 = arith.constant 0 : index
    %15 = vector.load %arg7[%c0_12, %c0_13] : memref<32x32xbf16, #tpu.memory_space<vmem>>, vector<32x32xbf16>
    %cst_14 = arith.constant dense<0.000000e+00> : vector<8x32xf32>
    %16 = tpu.matmul %2, %15, %cst_14 {dimension_numbers = #tpu.dot_dimension_numbers<[1], [0], [0], [1], [0, 0, 1, 1], [], []>} : vector<8x32xbf16>, vector<32x32xbf16>, vector<8x32xf32> -> vector<8x32xf32>
    %c0_15 = arith.constant 0 : index
    %c0_16 = arith.constant 0 : index
    %17 = vector.load %arg8[%c0_15, %c0_16] : memref<1x32xf32, #tpu.memory_space<vmem>>, vector<1x32xf32>
    %18 = vector.broadcast %17 : vector<1x32xf32> to vector<8x32xf32>
    %19 = arith.addf %16, %18 : vector<8x32xf32>
    %20 = arith.truncf %9 : vector<8x32xf32> to vector<8x32xbf16>
    %c0_17 = arith.constant 0 : index
    %c0_18 = arith.constant 0 : index
    %c0_19 = arith.constant 0 : index
    %21 = vector.load %arg9[%c0_17, %c0_18, %c0_19] : memref<1x8x32xbf16, #tpu.memory_space<vmem>>, vector<1x8x32xbf16>
    %22 = vector.shape_cast %21 : vector<1x8x32xbf16> to vector<8x32xbf16>
    %23 = vector.shape_cast %20 : vector<8x32xbf16> to vector<1x8x32xbf16>
    tpu.vector_store %arg9[%c0_17, %c0_18, %c0_19], %23 {strides = array<i32>} : memref<1x8x32xbf16, #tpu.memory_space<vmem>>, vector<1x8x32xbf16>,
    %24 = arith.truncf %14 : vector<8x32xf32> to vector<8x32xbf16>
    %c0_20 = arith.constant 0 : index
    %c0_21 = arith.constant 0 : index
    %c0_22 = arith.constant 0 : index
    %25 = vector.load %arg10[%c0_20, %c0_21, %c0_22] : memref<1x8x32xbf16, #tpu.memory_space<vmem>>, vector<1x8x32xbf16>
    %26 = vector.shape_cast %25 : vector<1x8x32xbf16> to vector<8x32xbf16>
    %27 = vector.shape_cast %24 : vector<8x32xbf16> to vector<1x8x32xbf16>
    tpu.vector_store %arg10[%c0_20, %c0_21, %c0_22], %27 {strides = array<i32>} : memref<1x8x32xbf16, #tpu.memory_space<vmem>>, vector<1x8x32xbf16>,
    %28 = arith.truncf %19 : vector<8x32xf32> to vector<8x32xbf16>
    %c0_23 = arith.constant 0 : index
    %c0_24 = arith.constant 0 : index
    %c0_25 = arith.constant 0 : index
    %29 = vector.load %arg11[%c0_23, %c0_24, %c0_25] : memref<1x8x32xbf16, #tpu.memory_space<vmem>>, vector<1x8x32xbf16>
    %30 = vector.shape_cast %29 : vector<1x8x32xbf16> to vector<8x32xbf16>
    %31 = vector.shape_cast %28 : vector<8x32xbf16> to vector<1x8x32xbf16>
    tpu.vector_store %arg11[%c0_23, %c0_24, %c0_25], %31 {strides = array<i32>} : memref<1x8x32xbf16, #tpu.memory_space<vmem>>, vector<1x8x32xbf16>,
    return
  }
  func.func @transform_0(%arg0: i32, %arg1: i32) -> (i32, i32, i32) {
    %c0_i32 = arith.constant 0 : i32
    %c0_i32_0 = arith.constant 0 : i32
    return %arg0, %arg1, %c0_i32 : i32, i32, i32
  }
  func.func @transform_1(%arg0: i32, %arg1: i32) -> (i32, i32) {
    %c0_i32 = arith.constant 0 : i32
    %c0_i32_0 = arith.constant 0 : i32
    %c0_i32_1 = arith.constant 0 : i32
    return %c0_i32, %c0_i32_0 : i32, i32
  }
  func.func @transform_2(%arg0: i32, %arg1: i32) -> (i32, i32) {
    %c0_i32 = arith.constant 0 : i32
    %c0_i32_0 = arith.constant 0 : i32
    %c0_i32_1 = arith.constant 0 : i32
    return %c0_i32, %c0_i32_0 : i32, i32
  }
  func.func @transform_3(%arg0: i32, %arg1: i32) -> (i32, i32) {
    %c0_i32 = arith.constant 0 : i32
    %c0_i32_0 = arith.constant 0 : i32
    %c0_i32_1 = arith.constant 0 : i32
    return %c0_i32, %c0_i32_0 : i32, i32
  }
  func.func @transform_4(%arg0: i32, %arg1: i32) -> (i32, i32) {
    %c0_i32 = arith.constant 0 : i32
    %c0_i32_0 = arith.constant 0 : i32
    %c0_i32_1 = arith.constant 0 : i32
    return %c0_i32, %c0_i32_0 : i32, i32
  }
  func.func @transform_5(%arg0: i32, %arg1: i32) -> (i32, i32) {
    %c0_i32 = arith.constant 0 : i32
    %c0_i32_0 = arith.constant 0 : i32
    %c0_i32_1 = arith.constant 0 : i32
    return %c0_i32, %c0_i32_0 : i32, i32
  }
  func.func @transform_6(%arg0: i32, %arg1: i32) -> (i32, i32) {
    %c0_i32 = arith.constant 0 : i32
    %c0_i32_0 = arith.constant 0 : i32
    %c0_i32_1 = arith.constant 0 : i32
    return %c0_i32, %c0_i32_0 : i32, i32
  }
  func.func @transform_7(%arg0: i32, %arg1: i32) -> (i32, i32, i32) {
    %c0_i32 = arith.constant 0 : i32
    %c0_i32_0 = arith.constant 0 : i32
    return %arg0, %arg1, %c0_i32 : i32, i32, i32
  }
  func.func @transform_8(%arg0: i32, %arg1: i32) -> (i32, i32, i32) {
    %c0_i32 = arith.constant 0 : i32
    %c0_i32_0 = arith.constant 0 : i32
    return %arg0, %arg1, %c0_i32 : i32, i32, i32
  }
  func.func @transform_9(%arg0: i32, %arg1: i32) -> (i32, i32, i32) {
    %c0_i32 = arith.constant 0 : i32
    %c0_i32_0 = arith.constant 0 : i32
    return %arg0, %arg1, %c0_i32 : i32, i32, i32
  }
}

</mosaic_0001>

<bundles_post_ra>
// kernel: tpu_custom_call.1
= control target key start
LH: loop header
LB: loop body
LE: loop exit
PB: predicated region body
PF: predicated region fallthrough
CT: control target
= control target key end

     0   :  { %s1644_s0 = inlined_call_operand.hbm [shape: f32[2,8,32], index: 0, kind: input, shape index: {}]   ;;  %s1645_s1 = inlined_call_operand.hbm [shape: bf16[32,32], index: 1, kind: input, shape index: {}]   ;;  %s1646_s2 = inlined_call_operand.vmem [shape: f32[1,32], index: 2, kind: input, shape index: {}]   ;;  %s1647_s3 = inlined_call_operand.hbm [shape: bf16[32,32], index: 3, kind: input, shape index: {}]   ;;  %s1648_s4 = inlined_call_operand.vmem [shape: f32[1,32], index: 4, kind: input, shape index: {}]   ;;  %s1649_s5 = inlined_call_operand.hbm [shape: bf16[32,32], index: 5, kind: input, shape index: {}]   ;;  %s1650_s6 = inlined_call_operand.vmem [shape: f32[1,32], index: 6, kind: input, shape index: {}]   ;;  %s1651_s7 = inlined_call_operand.hbm [shape: bf16[2,8,32], index: 7, kind: output, shape index: {0}]   ;;  %s1652_s8 = inlined_call_operand.hbm [shape: bf16[2,8,32], index: 8, kind: output, shape index: {1}]   ;;  %s1653_s9 = inlined_call_operand.hbm [shape: bf16[2,8,32], index: 9, kind: output, shape index: {2}]  }
   0x1   :  { %1661 = sst [smem:[#allocation21_spill]] %s1644_s0 }
   0x2   :  { %1662 = sst [smem:[#allocation22_spill]] %s1645_s1 }
   0x3   :  { %1663 = sst [smem:[#allocation23_spill]] %s1647_s3 }
   0x4   :  { %1664 = sst [smem:[#allocation24_spill]] %s1649_s5 }
   0x5   :  { %15 = vsyncpa [#allocation3], 0 }
   0x6   :  { %17 = vsyncpa [#allocation3 + $0x1], 0 }
   0x7   :  { %18 = vsyncpa [#allocation6], 0 }
   0x8   :  { %19 = vsyncpa [#allocation9], 0 }
   0x9   :  { %20 = vsyncpa [#allocation4], 0 }
   0xa   :  { %22 = vsyncpa [#allocation4 + $0x1], 0 }
   0xb   :  { %23 = vsyncpa [#allocation12], 0 }
   0xc   :  { %25 = vsyncpa [#allocation12 + $0x1], 0  ;;  %s1356_s30 = smov 0   ;;  %s1358_s10 = smov 0  }
   0xd   :  { %s1360_s11 = smov 0   ;;  %s1362_s12 = smov 0  }
   0xe   :  { %s1364_s13 = smov 0   ;;  %s1366_s14 = smov 0  }
   0xf LB: > { %s1387_s15 = sadd.s32 4294967295, %s1293_s14   ;;  %s1655_s16 = sadd.s32 4294967294, %s1293_s14   ;;  %s1293_s14 = sphi %s1366_s14, %s31_s14   ;;  %s1289_s13 = sphi %s1364_s13, %s1694_s13   ;;  %s1285_s12 = sphi %s1362_s12, %s1693_s12   ;;  %s1281_s11 = sphi %s1360_s11, %s1692_s11   ;;  %s1277_s10 = sphi %s1358_s10, %s1691_s10   ;;  %s1273_s30 = sphi %s1356_s30, %s1690_s30  }
  0x10   : > { %p65_p0 = scmp.ne.s32.totalorder %s1277_s10, %s1273_s30  ;;  %p1654_p1 = scmp.eq.s32.totalorder %s1387_s15, 0 }
  0x11   : > { %p223_p3 = scmp.eq.s32.totalorder %s1655_s16, 1  ;;  %p862_p5 = scmp.ge.s32.totalorder %s1293_s14, 1 }
  0x12   : > { %p1398_p4 = por %p1654_p1, %p65_p0  ;;  %p286_p7 = scmp.lt.s32.totalorder %s1293_s14, 3 }
  0x13   : > { %p1403_p6 = por %p223_p3, %p65_p0  ;;  %s1295_s20 = smov [#allocation5]  }
  0x14   : > { %s1665_s17 = scalar_select %p1398_p4, 1, 0 }
  0x15   : > { %s1666_s18 = scalar_select %p1403_p6, 1, 0 }
  0x16   : > { %p1408_p8 = pnand %p862_p5, %p286_p7  ;;  %s298_s21 = sshll.u32 %s1295_s20, 4  ;;  %s299_s21 = int_to_ptr.vmem [resolvable:$true] %s298_s21 }
  0x17   : > { %1667 = sst [smem:[#allocation19_spill]] %s1666_s18  ;;  %s1296_s23 = smov [#allocation7]  }
  0x18   : > { %p950_p9 = pneg %p1408_p8  ;;  %s314_s24 = sshll.u32 %s1296_s23, 4  ;;  %s315_s24 = int_to_ptr.vmem [resolvable:$true] %s314_s24 }
  0x19   : > { %s1297_s25 = smov [#allocation8]   ;;  %s1054_s27 = scalar_lea.vmem %s299_s21, 256 }
  0x1a   : > { %p1417_p11 = pnand %p950_p9, %p1654_p1  ;;  %s330_s26 = sshll.u32 %s1297_s25, 4  ;;  %s331_s26 = int_to_ptr.vmem [resolvable:$true] %s330_s26 }
  0x1b   : > { %p1055_p13 = scmp.ne.s32.totalorder %s299_s21, %s1054_s27  ;;  %p1062_p5 = scmp.lt.s32.totalorder %s299_s21, %s299_s21 }
  0x1c   : > { %p1045_p12 = pneg %p1417_p11  ;;  %p1063_p7 = scmp.lt.s32.totalorder %s1054_s27, %s1054_s27 }
  0x1e   : > { %p1057_p0 = pnand %p1055_p13, %p1045_p12  ;;  %p1064_p9 = por %p1063_p7, %p1062_p5 }
  0x20   : > { %p1058_p3 = pneg %p1057_p0 }
  0x22   : > { %p1065_p10 = pnand %p1064_p9, %p1058_p3 }
  0x24   : > { %1068 = shalt.err (!%p1065_p10)
}
  0x25   : > { %s1298_s28 = smov 64   ;;  %s1299_s29 = smov 4  }
  0x26   : > { %s1670_s1 = sld [smem:[#allocation22_spill]]  ;;  %s1080_s25 = scalar_lea.vmem %s315_s24, 256 }
  0x27   : > { %p1081_p1 = scmp.ne.s32.totalorder %s315_s24, %s1080_s25  ;;  %p1088_p2 = scmp.lt.s32.totalorder %s315_s24, %s315_s24 }
  0x28   : > { %p1089_p6 = scmp.lt.s32.totalorder %s1080_s25, %s1080_s25 }
  0x29   : > { %p1083_p13 = pnand %p1081_p1, %p1045_p12 }
  0x2a   : > { %p1090_p5 = por %p1089_p6, %p1088_p2 }
  0x2b   : > { %p1084_p0 = pneg %p1083_p13 }
  0x2c   : > { %953 = dma.hbm_to_vmem [thread:$0]  (!%p1417_p11), %s1670_s1, 256, %s299_s21, [#allocation6], %s1298_s28, %s1298_s28, %s1299_s29  }
  0x2d   : > { %p1091_p3 = pnand %p1090_p5, %p1084_p0 }
  0x2f   : > { %1094 = shalt.err (!%p1091_p3)
}
  0x30   : > { %s1671_s3 = sld [smem:[#allocation23_spill]]  ;;  %s1106_s21 = scalar_lea.vmem %s331_s26, 256 }
  0x31   : > { %p1107_p10 = scmp.ne.s32.totalorder %s331_s26, %s1106_s21  ;;  %p1114_p9 = scmp.lt.s32.totalorder %s331_s26, %s331_s26 }
  0x32   : > { %p1115_p13 = scmp.lt.s32.totalorder %s1106_s21, %s1106_s21 }
  0x33   : > { %p1109_p7 = pnand %p1107_p10, %p1045_p12 }
  0x34   : > { %p1116_p4 = por %p1115_p13, %p1114_p9 }
  0x35   : > { %p1110_p1 = pneg %p1109_p7 }
  0x36   : > { %956 = dma.hbm_to_vmem [thread:$0]  (!%p1417_p11), %s1671_s3, 256, %s315_s24, [#allocation6], %s1298_s28, %s1298_s28, %s1299_s29  }
  0x37   : > { %p1117_p2 = pnand %p1116_p4, %p1110_p1 }
  0x39   : > { %1120 = shalt.err (!%p1117_p2)
}
  0x3a   : > { %s1672_s5 = sld [smem:[#allocation24_spill]]  ;;  %s52_s16 = sadd.s32 1, %s1281_s11 }
  0x3b   : > { %s43_s24 = sadd.s32 1, %s1289_s13  ;;  %p59_p4 = scmp.ne.s32.totalorder %s1281_s11, %s1277_s10 }
  0x3c   : > { %p45_p6 = scmp.ge.s32.totalorder %s43_s24, 2  ;;  %p60_p12 = scmp.eq.s32.totalorder %s1293_s14, 0 }
  0x3d   : > { %p1673_p0 = scmp.eq.s32.totalorder %s1387_s15, 1  ;;  %p977_p3 = scmp.lt.s32.totalorder %s1293_s14, 2 }
  0x3e   : > { %s1696_s24 = smov (%p45_p6, %s43_s24), 0  ;;  %p61_p10 = por %p60_p12, %p59_p4 }
  0x3f   : > { %p1454_p5 = por %p1673_p0, %p59_p4  ;;  %1675 = sst [smem:[#allocation20_spill]] %s1696_s24 }
  0x40   : > { %959 = dma.hbm_to_vmem [thread:$0]  (!%p1417_p11), %s1672_s5, 256, %s331_s26, [#allocation9], %s1298_s28, %s1298_s28, %s1299_s29  }
  0x41   : > { %s347_s25 = sand.u32 1, %s1281_s11   ;;  %s47_s27 = ssub.s32 %s1289_s13, %s1696_s24 }
  0x42   : > { %p50_p7 = scmp.eq.s32.totalorder %s47_s27, 0  ;;  %s867_s26 = sshll.u32 %s347_s25, 3 }
  0x43   : > { %s868_s28 = sshll.u32 %s1289_s13, 7  ;;  %s1676_s0 = sld [smem:[#allocation21_spill]] }
  0x44   : > { %s1466_s29 = scalar_select %p50_p7, %s1281_s11, %s52_s16  }
  0x45   : > { %s351_s1 = scalar_lea.vmem [#allocation2], %s867_s26  ;;  %p1473_p11 = pnand %p977_p3, %p61_p10 }
  0x46   : > { %s359_s3 = sshll.u32 %s351_s1, 4  ;;  %s348_s18 = scalar_lea.sflag [#allocation3], %s347_s25  ;;  %s360_s3 = int_to_ptr.vmem [resolvable:$true] %s359_s3 }
  0x47   : > { %p1123_p1 = pneg %p1473_p11  ;;  %s1134_s27 = scalar_lea.vmem %s360_s3, 128 }
  0x48   : > { %p1135_p9 = scmp.ne.s32.totalorder %s360_s3, %s1134_s27  ;;  %s1300_s16 = smov [#allocation2]  }
  0x49   : > { %s357_s23 = scalar_lea.hbm %s1676_s0, %s868_s28  ;;  %s1139_s24 = sshll.u32 %s1300_s16, 4  ;;  %s1140_s24 = int_to_ptr.vmem [resolvable:$false] %s1139_s24 }
  0x4a   : > { %p1137_p13 = pnand %p1135_p9, %p1123_p1  ;;  %s1141_s28 = scalar_lea.vmem %s1140_s24, 256 }
  0x4b   : > { %p1142_p4 = scmp.lt.s32.totalorder %s360_s3, %s1140_s24  ;;  %p1143_p6 = scmp.lt.s32.totalorder %s1141_s28, %s1134_s27 }
  0x4c   : > { %p1138_p2 = pneg %p1137_p13 }
  0x4d   : > { %p1144_p12 = por %p1143_p6, %p1142_p4 }
  0x4f   : > { %p1145_p0 = pnand %p1144_p12, %p1138_p2 }
  0x51   : > { %1148 = shalt.err (!%p1145_p0)
}
  0x52   : > { %963 = dma.hbm_to_vmem [thread:$0]  (!%p1473_p11), %s357_s23, 128, %s360_s3, %s348_s18  }
  0x53   : > { %368 = sbr.rel (%p1408_p8) target bundleno = 361 (0x169), region = 48  ;;  %s1484_s1 = sand.u32 (!%p1408_p8), 1, %s1277_s10  }
  0x54   : > { %s870_s25 = sshll.u32 (!%p1408_p8), %s1484_s1, 3  ;;  %s371_s26 = scalar_lea.sflag (!%p1408_p8), [#allocation3], %s1484_s1 }
  0x55   : > { %s374_s21 = scalar_lea.vmem (!%p1408_p8), [#allocation2], %s870_s25  ;;  %p1678_p3 = scmp.ne.s32.totalorder (!%p1408_p8), %s1665_s17, 0 }
  0x58   : > { %1252 = dma.done.wait (%p1678_p3), %s371_s26, 128  }
  0x59   : > { %1254 = vsyncadd (%p1678_p3), %s371_s26, 4294967168  ;;  %p1679_p10 = scmp.eq.s32.totalorder %s1387_s15, 0 }
  0x5b   : > { %1256 = dma.done.wait (%p1679_p10), [#allocation6], 512   ;;  %p1680_p7 = pmov %p1679_p10 }
  0x5d   : > { %1258 = vsyncadd (%p1680_p7), [#allocation6], 4294966784  ;;  %p1681_p8 = pmov %p1680_p7 }
  0x5e   : > { %p1682_p11 = pmov %p1680_p7 }
  0x5f   : > { %1260 = dma.done.wait (%p1681_p8), [#allocation9], 256  }
  0x60   : > { %1262 = vsyncadd (%p1682_p11), [#allocation9], 4294967040  ;;  %v1301_v0 = vmov 0.0   ;;  %vm1302_vm0 = vmmov 0   ;;  %v1037_v1 = vld [vmem:[#allocation5 + $0x8] sm:$0xff]   ;;  %v1038_v2 = vld [vmem:[#allocation7 + $0x8] sm:$0xff]  }
  0x61   : > { %906 = vmatprep.subr.bf16.mxu0 %v1301_v0  ;;  %914 = vmatprep.subr.bf16.mxu1 %v1301_v0  ;;  %v1039_v3 = vld [vmem:[#allocation5] sm:$0xff]   ;;  %v1040_v4 = vld [vmem:[#allocation7] sm:$0xff]   ;;  %vm457_vm1 = vcmask 261120   ;;  %v1041_v7 = vld [vmem:[#allocation8 + $0x8] sm:$0xff]   ;;  %s1504_s3 = sshll.u32 %s1484_s1, 2  ;;  %s640_s24 = sand.u32 1, %s1387_s15  }
  0x62   : > { %910 = vmatprep.mubr.msk.bf16.mxu0 %vm1302_vm0, %v1301_v0  ;;  %918 = vmatprep.mubr.msk.bf16.mxu1 %vm1302_vm0, %v1301_v0  ;;  %v432_v5 = vld [vmem:[%s374_s21] sm:$0xff]  ;;  %v1042_v8 = vld [vmem:[#allocation8] sm:$0xff]   ;;  %s1514_s20 = sshll.u32 %s1285_s12, 6  ;;  %s423_s23 = scalar_lea.vmem [#allocation11], %s1504_s3  ;;  %vm629_vm2 = vcmask 257024  }
  0x63   : > { %907 = vmatpush3.bf16.msra.mxu0 %v1037_v1  ;;  %915 = vmatpush3.bf16.msra.mxu1 %v1038_v2  ;;  %v433_v6 = vpack.c.bf16 %v432_v5, %v432_v5  ;;  %v877_v9 = vld [vmem:[%s1646_s2] ss:$0 sm:$0xff]  ;;  %s674_s27 = sshll.u32 %s423_s23, 4  ;;  %s1659_s16 = scalar_lea.vmem [#allocation10], %s1504_s3  ;;  %s1526_s27 = int_to_ptr.vmem [resolvable:$true] %s674_s27 }
  0x64   : > { %908 = vmatprep.subr.bf16.mxu0 %v1301_v0  ;;  %916 = vmatprep.subr.bf16.mxu1 %v1301_v0  ;;  %v881_v10 = vld [vmem:[%s1648_s4] ss:$0 sm:$0xff]  ;;  %s660_s28 = sshll.u32 %s1659_s16, 4  ;;  %s1524_s12 = scalar_lea.hbm %s1652_s8, %s1514_s20  ;;  %s1534_s28 = int_to_ptr.vmem [resolvable:$true] %s660_s28 }
  0x65   : > { %s1532_s5 = scalar_lea.hbm %s1651_s7, %s1514_s20  ;;  %v885_v23 = vld [vmem:[%s1650_s6] ss:$0 sm:$0xff]  ;;  %s1660_s19 = scalar_lea.vmem [#allocation13], %s1504_s3 }
  0x66   : > { %s1543_s25 = sshll.u32 %s1660_s19, 4  ;;  %s1545_s15 = scalar_lea.sflag [#allocation12], %s640_s24  ;;  %s689_s25 = int_to_ptr.vmem [resolvable:$true] %s1543_s25 }
  0x67   : > { %909 = vmatpush3.bf16.msra.mxu0 %v1039_v3  ;;  %917 = vmatpush3.bf16.msra.mxu1 %v1040_v4  ;;  %s1149_s26 = scalar_lea.vmem %s1526_s27, 64  ;;  %s1303_s21 = smov [#allocation11]  }
  0x68   : > { %922 = vmatprep.subr.bf16.mxu0 %v1301_v0  ;;  %p1150_p1 = scmp.ne.s32.totalorder %s1526_s27, %s1149_s26  ;;  %s1153_s16 = sshll.u32 %s1303_s21, 4  ;;  %s1154_s16 = int_to_ptr.vmem [resolvable:$false] %s1153_s16 }
  0x69   : > { %s1155_s0 = scalar_lea.vmem %s1154_s16, 128  ;;  %p1156_p2 = scmp.lt.s32.totalorder %s1526_s27, %s1154_s16 }
  0x6a   : > { %911 = vmatmul.mubr.msk.bf16.vlgmr.msra.gmra.mxu0 %vm457_vm1, %v433_v6  ;;  %919 = vmatmul.mubr.msk.bf16.vlgmr.msra.gmra.mxu1 %vm457_vm1, %v433_v6  ;;  %p1151_p9 = pnand %p1150_p1, %p1454_p5  ;;  %p1157_p4 = scmp.lt.s32.totalorder %s1155_s0, %s1149_s26 }
  0x6b   : > { %923 = vmatpush3.bf16.msra.mxu0 %v1041_v7  ;;  %926 = vmatprep.mubr.msk.bf16.mxu0 %vm1302_vm0, %v1301_v0 }
  0x6c   : > { %924 = vmatprep.subr.bf16.mxu0 %v1301_v0  ;;  %p1152_p13 = pneg %p1151_p9  ;;  %p1158_p6 = por %p1157_p4, %p1156_p2 }
  0x6e   : > { %p1159_p12 = pnand %p1158_p6, %p1152_p13 }
  0x6f   : > { %925 = vmatpush3.bf16.msra.mxu0 %v1042_v8 }
  0x72   : > { %927 = vmatmul.mubr.msk.bf16.vlgmr.msra.gmra.mxu0 %vm457_vm1, %v433_v6 }
 0x12a   : > { %v495_v11 = vpop.f32.mrf.mxu0  ;;  %v559_v13 = vpop.f32.mrf.mxu1 }
 0x12b   : > { %v496_v12 = vadd.f32 %v877_v9, %v495_v11  ;;  %v560_v15 = vadd.f32 %v881_v10, %v559_v13 }
 0x12c   : > { %v912_v14 = vpop.f32.mrf.mxu0  ;;  %v920_v17 = vpop.f32.mrf.mxu1 }
 0x12d   : > { %v501_v16 = vmul.f32 0.35355338, %v496_v12  ;;  %v631_v18 = vpack.c.bf16 %v560_v15, %v560_v15 }
 0x12e   : > { %v498_v19 = vpop.f32.mrf.mxu0  ;;  %v562_v21 = vpop.f32.mrf.mxu1 }
 0x12f   : > { %v628_v20 = vpack.c.bf16 %v501_v16, %v501_v16  ;;  %632 = vst.msk [vmem:[%s423_s23] sm:$0xf] %vm629_vm2, %v631_v18 }
 0x130   : > { %v913_v22 = vpop.f32.mrf.mxu0  ;;  %v921_v24 = vpop.f32.mrf.mxu1 }
 0x131   : > { %1162 = shalt.err (!%p1159_p12)
}
 0x132   : > { %s1163_s24 = scalar_lea.hbm %s1524_s12, 64  ;;  %s1167_s18 = scalar_lea.hbm %s1652_s8, 128 }
 0x133   : > { %p1164_p0 = scmp.ne.s32.totalorder %s1524_s12, %s1163_s24  ;;  %p1168_p7 = scmp.lt.s32.totalorder %s1524_s12, %s1652_s8 }
 0x134   : > { %p1169_p8 = scmp.lt.s32.totalorder %s1167_s18, %s1163_s24 }
 0x135   : > { %p1165_p3 = pnand %p1164_p0, %p1454_p5 }
 0x136   : > { %p1170_p11 = por %p1169_p8, %p1168_p7 }
 0x137   : > { %p1166_p10 = pneg %p1165_p3 }
 0x139   : > { %p1171_p1 = pnand %p1170_p11, %p1166_p10 }
 0x13b   : > { %1174 = shalt.err (!%p1171_p1)
}
 0x13c   : > { %945 = dma.vmem_to_hbm [thread:$0]  (%p1454_p5), %s1526_s27, 64, %s1524_s12, %s1545_s15   ;;  %v622_v25 = vpop.f32.mrf.mxu0 }
 0x13d   : > { %s1683_s0 = scalar_lea.vmem [#allocation10], %s1504_s3  ;;  %s636_s16 = scalar_lea.sflag [#allocation4], %s1484_s1 }
 0x13e   : > { %630 = vst.msk [vmem:[%s1683_s0] sm:$0xf] %vm629_vm2, %v628_v20  ;;  %s1175_s19 = scalar_lea.vmem %s1534_s28, 64  ;;  %s1304_s26 = smov [#allocation10]  }
 0x13f   : > { %p1176_p9 = scmp.ne.s32.totalorder %s1534_s28, %s1175_s19  ;;  %s1179_s24 = sshll.u32 %s1304_s26, 4  ;;  %s1180_s24 = int_to_ptr.vmem [resolvable:$false] %s1179_s24 }
 0x140   : > { %s1181_s23 = scalar_lea.vmem %s1180_s24, 128  ;;  %p1182_p4 = scmp.lt.s32.totalorder %s1534_s28, %s1180_s24 }
 0x141   : > { %p1177_p13 = pnand %p1176_p9, %p1454_p5  ;;  %p1183_p6 = scmp.lt.s32.totalorder %s1181_s23, %s1175_s19 }
 0x143   : > { %p1178_p2 = pneg %p1177_p13  ;;  %p1184_p12 = por %p1183_p6, %p1182_p4 }
 0x145   : > { %p1185_p0 = pnand %p1184_p12, %p1178_p2 }
 0x147   : > { %1188 = shalt.err (!%p1185_p0)
}
 0x148   : > { %s1189_s27 = scalar_lea.hbm %s1532_s5, 64  ;;  %s1193_s17 = scalar_lea.hbm %s1651_s7, 128 }
 0x149   : > { %p1190_p3 = scmp.ne.s32.totalorder %s1532_s5, %s1189_s27  ;;  %p1194_p8 = scmp.lt.s32.totalorder %s1532_s5, %s1651_s7 }
 0x14a   : > { %p1195_p11 = scmp.lt.s32.totalorder %s1193_s17, %s1189_s27 }
 0x14b   : > { %p1191_p10 = pnand %p1190_p3, %p1454_p5 }
 0x14c   : > { %p1196_p1 = por %p1195_p11, %p1194_p8 }
 0x14d   : > { %p1192_p7 = pneg %p1191_p10 }
 0x14f   : > { %p1197_p9 = pnand %p1196_p1, %p1192_p7 }
 0x151   : > { %1200 = shalt.err (!%p1197_p9)
}
 0x152   : > { %944 = dma.vmem_to_hbm [thread:$0]  (%p1454_p5), %s1534_s28, 64, %s1532_s5, %s636_s16   ;;  %v623_v26 = vadd.f32 %v885_v23, %v622_v25  ;;  %v928_v27 = vpop.f32.mrf.mxu0 }
 0x153   : > { %s1596_s26 = scalar_lea.hbm %s1653_s9, %s1514_s20  ;;  %s1684_s24 = scalar_lea.vmem [#allocation13], %s1504_s3 }
 0x154   : > { %v633_v28 = vpack.c.bf16 %v623_v26, %v623_v26  ;;  %v625_v29 = vpop.f32.mrf.mxu0  ;;  %s1201_s23 = scalar_lea.vmem %s689_s25, 64  ;;  %s1305_s28 = smov [#allocation13]  }
 0x155   : > { %p1202_p13 = scmp.ne.s32.totalorder %s689_s25, %s1201_s23  ;;  %s1205_s5 = sshll.u32 %s1305_s28, 4  ;;  %s1206_s5 = int_to_ptr.vmem [resolvable:$false] %s1205_s5 }
 0x156   : > { %634 = vst.msk [vmem:[%s1684_s24] sm:$0xf] %vm629_vm2, %v633_v28  ;;  %v929_v30 = vpop.f32.mrf.mxu0  ;;  %s1207_s16 = scalar_lea.vmem %s1206_s5, 128  ;;  %p1208_p6 = scmp.lt.s32.totalorder %s689_s25, %s1206_s5 }
 0x157   : > { %p1203_p2 = pnand %p1202_p13, %p1454_p5  ;;  %p1209_p12 = scmp.lt.s32.totalorder %s1207_s16, %s1201_s23 }
 0x159   : > { %p1204_p4 = pneg %p1203_p2  ;;  %p1210_p0 = por %p1209_p12, %p1208_p6 }
 0x15b   : > { %p1211_p3 = pnand %p1210_p0, %p1204_p4 }
 0x15d   : > { %1214 = shalt.err (!%p1211_p3)
}
 0x15e   : > { %s1215_s3 = scalar_lea.hbm %s1596_s26, 64  ;;  %s1219_s1 = scalar_lea.hbm %s1653_s9, 128 }
 0x15f   : > { %p1216_p10 = scmp.ne.s32.totalorder %s1596_s26, %s1215_s3  ;;  %p1220_p11 = scmp.lt.s32.totalorder %s1596_s26, %s1653_s9 }
 0x160   : > { %p1221_p1 = scmp.lt.s32.totalorder %s1219_s1, %s1215_s3 }
 0x161   : > { %p1217_p7 = pnand %p1216_p10, %p1454_p5 }
 0x162   : > { %p1222_p9 = por %p1221_p1, %p1220_p11 }
 0x163   : > { %p1218_p8 = pneg %p1217_p7 }
 0x165   : > { %p1223_p13 = pnand %p1222_p9, %p1218_p8 }
 0x167   : > { %1226 = shalt.err (!%p1223_p13)
}
 0x168   : > { %946 = dma.vmem_to_hbm [thread:$0]  (%p1454_p5), %s689_s25, 64, %s1596_s26, %s1545_s15  }
 0x169 PF: > { %s1685_s18 = sld [smem:[#allocation19_spill]]  ;;  %s700_s21 = sand.u32 1, %s1273_s30  }
 0x16a   : > { %p1687_p4 = scmp.ge.s32.totalorder %s1293_s14, 2  ;;  %s701_s0 = scalar_lea.sflag [#allocation4], %s700_s21 }
 0x16f   : > { %p1686_p2 = scmp.ne.s32.totalorder %s1685_s18, 0 }
 0x171   : > { %p965_p6 = pnand %p1687_p4, %p1686_p2 }
 0x173   : > { %p966_p12 = pneg %p965_p6 }
 0x175   : > { %1264 = dma.done.wait (%p966_p12), %s701_s0, 64  }
 0x176   : > { %1266 = vsyncadd (%p966_p12), %s701_s0, 4294967232  ;;  %s1688_s19 = sadd.s32 4294967294, %s1293_s14  }
 0x177   : > { %s709_s24 = sand.u32 1, %s1688_s19  }
 0x178   : > { %s710_s23 = scalar_lea.sflag [#allocation12], %s709_s24 }
 0x179   : > { %1268 = dma.done.wait (%p966_p12), %s710_s23, 128  }
 0x17a   : > { %1270 = vsyncadd (%p966_p12), %s710_s23, 4294967168  ;;  %s31_s14 = sadd.s32 1, %s1293_s14   ;;  %s1689_s22 = sld [smem:[#allocation20_spill]] }
 0x17b   : > { %p28_p5 = scmp.ge.s32.totalorder %s31_s14, 4   ;;  %s1690_s30 = smov %s1277_s10 }
 0x17c   : > { %s1691_s10 = smov %s1281_s11  ;;  %s1692_s11 = smov %s1466_s29 }
 0x17d   : > { %s1693_s12 = smov %s1289_s13  ;;  %30 = sbr.rel (!%p28_p5) target bundleno = 15 (0xf), region = 137 }
 0x180   : > { %s1694_s13 = smov %s1689_s22 }
 0x182   :  { %724 = vsyncpa [#allocation3], 1 }
 0x183   :  { %726 = vsyncpa [#allocation3 + $0x1], 1 }
 0x184   :  { %727 = vsyncpa [#allocation6], 1 }
 0x185   :  { %728 = vsyncpa [#allocation9], 1 }
 0x186   :  { %729 = vsyncpa [#allocation4], 1 }
 0x187   :  { %731 = vsyncpa [#allocation4 + $0x1], 1 }
 0x188   :  { %732 = vsyncpa [#allocation12], 1 }
 0x189   :  { %734 = vsyncpa [#allocation12 + $0x1], 1 }

// kernel: tpu_custom_call.1
= control target key start
LH: loop header
LB: loop body
LE: loop exit
PB: predicated region body
PF: predicated region fallthrough
CT: control target
= control target key end

     0   :  { %s1644_s0 = inlined_call_operand.hbm [shape: f32[2,8,32], index: 0, kind: input, shape index: {}]   ;;  %s1645_s1 = inlined_call_operand.hbm [shape: bf16[32,32], index: 1, kind: input, shape index: {}]   ;;  %s1646_s2 = inlined_call_operand.vmem [shape: f32[1,32], index: 2, kind: input, shape index: {}]   ;;  %s1647_s3 = inlined_call_operand.hbm [shape: bf16[32,32], index: 3, kind: input, shape index: {}]   ;;  %s1648_s4 = inlined_call_operand.vmem [shape: f32[1,32], index: 4, kind: input, shape index: {}]   ;;  %s1649_s5 = inlined_call_operand.hbm [shape: bf16[32,32], index: 5, kind: input, shape index: {}]   ;;  %s1650_s6 = inlined_call_operand.vmem [shape: f32[1,32], index: 6, kind: input, shape index: {}]   ;;  %s1651_s7 = inlined_call_operand.hbm [shape: bf16[2,8,32], index: 7, kind: output, shape index: {0}]   ;;  %s1652_s8 = inlined_call_operand.hbm [shape: bf16[2,8,32], index: 8, kind: output, shape index: {1}]   ;;  %s1653_s9 = inlined_call_operand.hbm [shape: bf16[2,8,32], index: 9, kind: output, shape index: {2}]  }
   0x1   :  { %1661 = sst [smem:[#allocation21_spill]] %s1644_s0 }
   0x2   :  { %1662 = sst [smem:[#allocation22_spill]] %s1645_s1 }
   0x3   :  { %1663 = sst [smem:[#allocation23_spill]] %s1647_s3 }
   0x4   :  { %1664 = sst [smem:[#allocation24_spill]] %s1649_s5 }
   0x5   :  { %15 = vsyncpa [#allocation3], 0 }
   0x6   :  { %17 = vsyncpa [#allocation3 + $0x1], 0 }
   0x7   :  { %18 = vsyncpa [#allocation6], 0 }
   0x8   :  { %19 = vsyncpa [#allocation9], 0 }
   0x9   :  { %20 = vsyncpa [#allocation4], 0 }
   0xa   :  { %22 = vsyncpa [#allocation4 + $0x1], 0 }
   0xb   :  { %23 = vsyncpa [#allocation12], 0 }
   0xc   :  { %25 = vsyncpa [#allocation12 + $0x1], 0  ;;  %s1356_s30 = smov 0   ;;  %s1358_s10 = smov 0  }
   0xd   :  { %s1360_s11 = smov 0   ;;  %s1362_s12 = smov 0  }
   0xe   :  { %s1364_s13 = smov 0   ;;  %s1366_s14 = smov 0  }
   0xf LB: > { %s1387_s15 = sadd.s32 4294967295, %s1293_s14   ;;  %s1655_s16 = sadd.s32 4294967294, %s1293_s14   ;;  %s1293_s14 = sphi %s1366_s14, %s31_s14   ;;  %s1289_s13 = sphi %s1364_s13, %s1694_s13   ;;  %s1285_s12 = sphi %s1362_s12, %s1693_s12   ;;  %s1281_s11 = sphi %s1360_s11, %s1692_s11   ;;  %s1277_s10 = sphi %s1358_s10, %s1691_s10   ;;  %s1273_s30 = sphi %s1356_s30, %s1690_s30  }
  0x10   : > { %p65_p0 = scmp.ne.s32.totalorder %s1277_s10, %s1273_s30  ;;  %p1654_p1 = scmp.eq.s32.totalorder %s1387_s15, 0 }
  0x11   : > { %p223_p3 = scmp.eq.s32.totalorder %s1655_s16, 1  ;;  %p862_p5 = scmp.ge.s32.totalorder %s1293_s14, 1 }
  0x12   : > { %p1398_p4 = por %p1654_p1, %p65_p0  ;;  %p286_p7 = scmp.lt.s32.totalorder %s1293_s14, 3 }
  0x13   : > { %p1403_p6 = por %p223_p3, %p65_p0  ;;  %s1295_s20 = smov [#allocation5]  }
  0x14   : > { %s1665_s17 = scalar_select %p1398_p4, 1, 0 }
  0x15   : > { %s1666_s18 = scalar_select %p1403_p6, 1, 0 }
  0x16   : > { %p1408_p8 = pnand %p862_p5, %p286_p7  ;;  %s298_s21 = sshll.u32 %s1295_s20, 4  ;;  %s299_s21 = int_to_ptr.vmem [resolvable:$true] %s298_s21 }
  0x17   : > { %1667 = sst [smem:[#allocation19_spill]] %s1666_s18  ;;  %s1296_s23 = smov [#allocation7]  }
  0x18   : > { %p950_p9 = pneg %p1408_p8  ;;  %s314_s24 = sshll.u32 %s1296_s23, 4  ;;  %s315_s24 = int_to_ptr.vmem [resolvable:$true] %s314_s24 }
  0x19   : > { %s1297_s25 = smov [#allocation8]   ;;  %s1054_s27 = scalar_lea.vmem %s299_s21, 256 }
  0x1a   : > { %p1417_p11 = pnand %p950_p9, %p1654_p1  ;;  %s330_s26 = sshll.u32 %s1297_s25, 4  ;;  %s331_s26 = int_to_ptr.vmem [resolvable:$true] %s330_s26 }
  0x1b   : > { %p1055_p13 = scmp.ne.s32.totalorder %s299_s21, %s1054_s27  ;;  %p1062_p5 = scmp.lt.s32.totalorder %s299_s21, %s299_s21 }
  0x1c   : > { %p1045_p12 = pneg %p1417_p11  ;;  %p1063_p7 = scmp.lt.s32.totalorder %s1054_s27, %s1054_s27 }
  0x1e   : > { %p1057_p0 = pnand %p1055_p13, %p1045_p12  ;;  %p1064_p9 = por %p1063_p7, %p1062_p5 }
  0x20   : > { %p1058_p3 = pneg %p1057_p0 }
  0x22   : > { %p1065_p10 = pnand %p1064_p9, %p1058_p3 }
  0x24   : > { %1068 = shalt.err (!%p1065_p10)
}
  0x25   : > { %s1298_s28 = smov 64   ;;  %s1299_s29 = smov 4  }
  0x26   : > { %s1670_s1 = sld [smem:[#allocation22_spill]]  ;;  %s1080_s25 = scalar_lea.vmem %s315_s24, 256 }
  0x27   : > { %p1081_p1 = scmp.ne.s32.totalorder %s315_s24, %s1080_s25  ;;  %p1088_p2 = scmp.lt.s32.totalorder %s315_s24, %s315_s24 }
  0x28   : > { %p1089_p6 = scmp.lt.s32.totalorder %s1080_s25, %s1080_s25 }
  0x29   : > { %p1083_p13 = pnand %p1081_p1, %p1045_p12 }
  0x2a   : > { %p1090_p5 = por %p1089_p6, %p1088_p2 }
  0x2b   : > { %p1084_p0 = pneg %p1083_p13 }
  0x2c   : > { %953 = dma.hbm_to_vmem [thread:$0]  (!%p1417_p11), %s1670_s1, 256, %s299_s21, [#allocation6], %s1298_s28, %s1298_s28, %s1299_s29  }
  0x2d   : > { %p1091_p3 = pnand %p1090_p5, %p1084_p0 }
  0x2f   : > { %1094 = shalt.err (!%p1091_p3)
}
  0x30   : > { %s1671_s3 = sld [smem:[#allocation23_spill]]  ;;  %s1106_s21 = scalar_lea.vmem %s331_s26, 256 }
  0x31   : > { %p1107_p10 = scmp.ne.s32.totalorder %s331_s26, %s1106_s21  ;;  %p1114_p9 = scmp.lt.s32.totalorder %s331_s26, %s331_s26 }
  0x32   : > { %p1115_p13 = scmp.lt.s32.totalorder %s1106_s21, %s1106_s21 }
  0x33   : > { %p1109_p7 = pnand %p1107_p10, %p1045_p12 }
  0x34   : > { %p1116_p4 = por %p1115_p13, %p1114_p9 }
  0x35   : > { %p1110_p1 = pneg %p1109_p7 }
  0x36   : > { %956 = dma.hbm_to_vmem [thread:$0]  (!%p1417_p11), %s1671_s3, 256, %s315_s24, [#allocation6], %s1298_s28, %s1298_s28, %s1299_s29  }
  0x37   : > { %p1117_p2 = pnand %p1116_p4, %p1110_p1 }
  0x39   : > { %1120 = shalt.err (!%p1117_p2)
}
  0x3a   : > { %s1672_s5 = sld [smem:[#allocation24_spill]]  ;;  %s52_s16 = sadd.s32 1, %s1281_s11 }
  0x3b   : > { %s43_s24 = sadd.s32 1, %s1289_s13  ;;  %p59_p4 = scmp.ne.s32.totalorder %s1281_s11, %s1277_s10 }
  0x3c   : > { %p45_p6 = scmp.ge.s32.totalorder %s43_s24, 2  ;;  %p60_p12 = scmp.eq.s32.totalorder %s1293_s14, 0 }
  0x3d   : > { %p1673_p0 = scmp.eq.s32.totalorder %s1387_s15, 1  ;;  %p977_p3 = scmp.lt.s32.totalorder %s1293_s14, 2 }
  0x3e   : > { %s1696_s24 = smov (%p45_p6, %s43_s24), 0  ;;  %p61_p10 = por %p60_p12, %p59_p4 }
  0x3f   : > { %p1454_p5 = por %p1673_p0, %p59_p4  ;;  %1675 = sst [smem:[#allocation20_spill]] %s1696_s24 }
  0x40   : > { %959 = dma.hbm_to_vmem [thread:$0]  (!%p1417_p11), %s1672_s5, 256, %s331_s26, [#allocation9], %s1298_s28, %s1298_s28, %s1299_s29  }
  0x41   : > { %s347_s25 = sand.u32 1, %s1281_s11   ;;  %s47_s27 = ssub.s32 %s1289_s13, %s1696_s24 }
  0x42   : > { %p50_p7 = scmp.eq.s32.totalorder %s47_s27, 0  ;;  %s867_s26 = sshll.u32 %s347_s25, 3 }
  0x43   : > { %s868_s28 = sshll.u32 %s1289_s13, 7  ;;  %s1676_s0 = sld [smem:[#allocation21_spill]] }
  0x44   : > { %s1466_s29 = scalar_select %p50_p7, %s1281_s11, %s52_s16  }
  0x45   : > { %s351_s1 = scalar_lea.vmem [#allocation2], %s867_s26  ;;  %p1473_p11 = pnand %p977_p3, %p61_p10 }
  0x46   : > { %s359_s3 = sshll.u32 %s351_s1, 4  ;;  %s348_s18 = scalar_lea.sflag [#allocation3], %s347_s25  ;;  %s360_s3 = int_to_ptr.vmem [resolvable:$true] %s359_s3 }
  0x47   : > { %p1123_p1 = pneg %p1473_p11  ;;  %s1134_s27 = scalar_lea.vmem %s360_s3, 128 }
  0x48   : > { %p1135_p9 = scmp.ne.s32.totalorder %s360_s3, %s1134_s27  ;;  %s1300_s16 = smov [#allocation2]  }
  0x49   : > { %s357_s23 = scalar_lea.hbm %s1676_s0, %s868_s28  ;;  %s1139_s24 = sshll.u32 %s1300_s16, 4  ;;  %s1140_s24 = int_to_ptr.vmem [resolvable:$false] %s1139_s24 }
  0x4a   : > { %p1137_p13 = pnand %p1135_p9, %p1123_p1  ;;  %s1141_s28 = scalar_lea.vmem %s1140_s24, 256 }
  0x4b   : > { %p1142_p4 = scmp.lt.s32.totalorder %s360_s3, %s1140_s24  ;;  %p1143_p6 = scmp.lt.s32.totalorder %s1141_s28, %s1134_s27 }
  0x4c   : > { %p1138_p2 = pneg %p1137_p13 }
  0x4d   : > { %p1144_p12 = por %p1143_p6, %p1142_p4 }
  0x4f   : > { %p1145_p0 = pnand %p1144_p12, %p1138_p2 }
  0x51   : > { %1148 = shalt.err (!%p1145_p0)
}
  0x52   : > { %963 = dma.hbm_to_vmem [thread:$0]  (!%p1473_p11), %s357_s23, 128, %s360_s3, %s348_s18  }
  0x53   : > { %368 = sbr.rel (%p1408_p8) target bundleno = 361 (0x169), region = 48  ;;  %s1484_s1 = sand.u32 (!%p1408_p8), 1, %s1277_s10  }
  0x54   : > { %s870_s25 = sshll.u32 (!%p1408_p8), %s1484_s1, 3  ;;  %s371_s26 = scalar_lea.sflag (!%p1408_p8), [#allocation3], %s1484_s1 }
  0x55   : > { %s374_s21 = scalar_lea.vmem (!%p1408_p8), [#allocation2], %s870_s25  ;;  %p1678_p3 = scmp.ne.s32.totalorder (!%p1408_p8), %s1665_s17, 0 }
  0x58   : > { %1252 = dma.done.wait (%p1678_p3), %s371_s26, 128  }
  0x59   : > { %1254 = vsyncadd (%p1678_p3), %s371_s26, 4294967168  ;;  %p1679_p10 = scmp.eq.s32.totalorder %s1387_s15, 0 }
  0x5b   : > { %1256 = dma.done.wait (%p1679_p10), [#allocation6], 512   ;;  %p1680_p7 = pmov %p1679_p10 }
  0x5d   : > { %1258 = vsyncadd (%p1680_p7), [#allocation6], 4294966784  ;;  %p1681_p8 = pmov %p1680_p7 }
  0x5e   : > { %p1682_p11 = pmov %p1680_p7 }
  0x5f   : > { %1260 = dma.done.wait (%p1681_p8), [#allocation9], 256  }
  0x60   : > { %1262 = vsyncadd (%p1682_p11), [#allocation9], 4294967040  ;;  %v1301_v0 = vmov 0.0   ;;  %vm1302_vm0 = vmmov 0   ;;  %v1037_v1 = vld [vmem:[#allocation5 + $0x8] sm:$0xff]   ;;  %v1038_v2 = vld [vmem:[#allocation7 + $0x8] sm:$0xff]  }
  0x61   : > { %906 = vmatprep.subr.bf16.mxu0 %v1301_v0  ;;  %914 = vmatprep.subr.bf16.mxu1 %v1301_v0  ;;  %v1039_v3 = vld [vmem:[#allocation5] sm:$0xff]   ;;  %v1040_v4 = vld [vmem:[#allocation7] sm:$0xff]   ;;  %vm457_vm1 = vcmask 261120   ;;  %v1041_v7 = vld [vmem:[#allocation8 + $0x8] sm:$0xff]   ;;  %s1504_s3 = sshll.u32 %s1484_s1, 2  ;;  %s640_s24 = sand.u32 1, %s1387_s15  }
  0x62   : > { %910 = vmatprep.mubr.msk.bf16.mxu0 %vm1302_vm0, %v1301_v0  ;;  %918 = vmatprep.mubr.msk.bf16.mxu1 %vm1302_vm0, %v1301_v0  ;;  %v432_v5 = vld [vmem:[%s374_s21] sm:$0xff]  ;;  %v1042_v8 = vld [vmem:[#allocation8] sm:$0xff]   ;;  %s1514_s20 = sshll.u32 %s1285_s12, 6  ;;  %s423_s23 = scalar_lea.vmem [#allocation11], %s1504_s3  ;;  %vm629_vm2 = vcmask 257024  }
  0x63   : > { %907 = vmatpush3.bf16.msra.mxu0 %v1037_v1  ;;  %915 = vmatpush3.bf16.msra.mxu1 %v1038_v2  ;;  %v433_v6 = vpack.c.bf16 %v432_v5, %v432_v5  ;;  %v877_v9 = vld [vmem:[%s1646_s2] ss:$0 sm:$0xff]  ;;  %s674_s27 = sshll.u32 %s423_s23, 4  ;;  %s1659_s16 = scalar_lea.vmem [#allocation10], %s1504_s3  ;;  %s1526_s27 = int_to_ptr.vmem [resolvable:$true] %s674_s27 }
  0x64   : > { %908 = vmatprep.subr.bf16.mxu0 %v1301_v0  ;;  %916 = vmatprep.subr.bf16.mxu1 %v1301_v0  ;;  %v881_v10 = vld [vmem:[%s1648_s4] ss:$0 sm:$0xff]  ;;  %s660_s28 = sshll.u32 %s1659_s16, 4  ;;  %s1524_s12 = scalar_lea.hbm %s1652_s8, %s1514_s20  ;;  %s1534_s28 = int_to_ptr.vmem [resolvable:$true] %s660_s28 }
  0x65   : > { %s1532_s5 = scalar_lea.hbm %s1651_s7, %s1514_s20  ;;  %v885_v23 = vld [vmem:[%s1650_s6] ss:$0 sm:$0xff]  ;;  %s1660_s19 = scalar_lea.vmem [#allocation13], %s1504_s3 }
  0x66   : > { %s1543_s25 = sshll.u32 %s1660_s19, 4  ;;  %s1545_s15 = scalar_lea.sflag [#allocation12], %s640_s24  ;;  %s689_s25 = int_to_ptr.vmem [resolvable:$true] %s1543_s25 }
  0x67   : > { %909 = vmatpush3.bf16.msra.mxu0 %v1039_v3  ;;  %917 = vmatpush3.bf16.msra.mxu1 %v1040_v4  ;;  %s1149_s26 = scalar_lea.vmem %s1526_s27, 64  ;;  %s1303_s21 = smov [#allocation11]  }
  0x68   : > { %922 = vmatprep.subr.bf16.mxu0 %v1301_v0  ;;  %p1150_p1 = scmp.ne.s32.totalorder %s1526_s27, %s1149_s26  ;;  %s1153_s16 = sshll.u32 %s1303_s21, 4  ;;  %s1154_s16 = int_to_ptr.vmem [resolvable:$false] %s1153_s16 }
  0x69   : > { %s1155_s0 = scalar_lea.vmem %s1154_s16, 128  ;;  %p1156_p2 = scmp.lt.s32.totalorder %s1526_s27, %s1154_s16 }
  0x6a   : > { %911 = vmatmul.mubr.msk.bf16.vlgmr.msra.gmra.mxu0 %vm457_vm1, %v433_v6  ;;  %919 = vmatmul.mubr.msk.bf16.vlgmr.msra.gmra.mxu1 %vm457_vm1, %v433_v6  ;;  %p1151_p9 = pnand %p1150_p1, %p1454_p5  ;;  %p1157_p4 = scmp.lt.s32.totalorder %s1155_s0, %s1149_s26 }
  0x6b   : > { %923 = vmatpush3.bf16.msra.mxu0 %v1041_v7  ;;  %926 = vmatprep.mubr.msk.bf16.mxu0 %vm1302_vm0, %v1301_v0 }
  0x6c   : > { %924 = vmatprep.subr.bf16.mxu0 %v1301_v0  ;;  %p1152_p13 = pneg %p1151_p9  ;;  %p1158_p6 = por %p1157_p4, %p1156_p2 }
  0x6e   : > { %p1159_p12 = pnand %p1158_p6, %p1152_p13 }
  0x6f   : > { %925 = vmatpush3.bf16.msra.mxu0 %v1042_v8 }
  0x72   : > { %927 = vmatmul.mubr.msk.bf16.vlgmr.msra.gmra.mxu0 %vm457_vm1, %v433_v6 }
 0x12a   : > { %v495_v11 = vpop.f32.mrf.mxu0  ;;  %v559_v13 = vpop.f32.mrf.mxu1 }
 0x12b   : > { %v496_v12 = vadd.f32 %v877_v9, %v495_v11  ;;  %v560_v15 = vadd.f32 %v881_v10, %v559_v13 }
 0x12c   : > { %v912_v14 = vpop.f32.mrf.mxu0  ;;  %v920_v17 = vpop.f32.mrf.mxu1 }
 0x12d   : > { %v501_v16 = vmul.f32 0.35355338, %v496_v12  ;;  %v631_v18 = vpack.c.bf16 %v560_v15, %v560_v15 }
 0x12e   : > { %v498_v19 = vpop.f32.mrf.mxu0  ;;  %v562_v21 = vpop.f32.mrf.mxu1 }
 0x12f   : > { %v628_v20 = vpack.c.bf16 %v501_v16, %v501_v16  ;;  %632 = vst.msk [vmem:[%s423_s23] sm:$0xf] %vm629_vm2, %v631_v18 }
 0x130   : > { %v913_v22 = vpop.f32.mrf.mxu0  ;;  %v921_v24 = vpop.f32.mrf.mxu1 }
 0x131   : > { %1162 = shalt.err (!%p1159_p12)
}
 0x132   : > { %s1163_s24 = scalar_lea.hbm %s1524_s12, 64  ;;  %s1167_s18 = scalar_lea.hbm %s1652_s8, 128 }
 0x133   : > { %p1164_p0 = scmp.ne.s32.totalorder %s1524_s12, %s1163_s24  ;;  %p1168_p7 = scmp.lt.s32.totalorder %s1524_s12, %s1652_s8 }
 0x134   : > { %p1169_p8 = scmp.lt.s32.totalorder %s1167_s18, %s1163_s24 }
 0x135   : > { %p1165_p3 = pnand %p1164_p0, %p1454_p5 }
 0x136   : > { %p1170_p11 = por %p1169_p8, %p1168_p7 }
 0x137   : > { %p1166_p10 = pneg %p1165_p3 }
 0x139   : > { %p1171_p1 = pnand %p1170_p11, %p1166_p10 }
 0x13b   : > { %1174 = shalt.err (!%p1171_p1)
}
 0x13c   : > { %945 = dma.vmem_to_hbm [thread:$0]  (%p1454_p5), %s1526_s27, 64, %s1524_s12, %s1545_s15   ;;  %v622_v25 = vpop.f32.mrf.mxu0 }
 0x13d   : > { %s1683_s0 = scalar_lea.vmem [#allocation10], %s1504_s3  ;;  %s636_s16 = scalar_lea.sflag [#allocation4], %s1484_s1 }
 0x13e   : > { %630 = vst.msk [vmem:[%s1683_s0] sm:$0xf] %vm629_vm2, %v628_v20  ;;  %s1175_s19 = scalar_lea.vmem %s1534_s28, 64  ;;  %s1304_s26 = smov [#allocation10]  }
 0x13f   : > { %p1176_p9 = scmp.ne.s32.totalorder %s1534_s28, %s1175_s19  ;;  %s1179_s24 = sshll.u32 %s1304_s26, 4  ;;  %s1180_s24 = int_to_ptr.vmem [resolvable:$false] %s1179_s24 }
 0x140   : > { %s1181_s23 = scalar_lea.vmem %s1180_s24, 128  ;;  %p1182_p4 = scmp.lt.s32.totalorder %s1534_s28, %s1180_s24 }
 0x141   : > { %p1177_p13 = pnand %p1176_p9, %p1454_p5  ;;  %p1183_p6 = scmp.lt.s32.totalorder %s1181_s23, %s1175_s19 }
 0x143   : > { %p1178_p2 = pneg %p1177_p13  ;;  %p1184_p12 = por %p1183_p6, %p1182_p4 }
 0x145   : > { %p1185_p0 = pnand %p1184_p12, %p1178_p2 }
 0x147   : > { %1188 = shalt.err (!%p1185_p0)
}
 0x148   : > { %s1189_s27 = scalar_lea.hbm %s1532_s5, 64  ;;  %s1193_s17 = scalar_lea.hbm %s1651_s7, 128 }
 0x149   : > { %p1190_p3 = scmp.ne.s32.totalorder %s1532_s5, %s1189_s27  ;;  %p1194_p8 = scmp.lt.s32.totalorder %s1532_s5, %s1651_s7 }
 0x14a   : > { %p1195_p11 = scmp.lt.s32.totalorder %s1193_s17, %s1189_s27 }
 0x14b   : > { %p1191_p10 = pnand %p1190_p3, %p1454_p5 }
 0x14c   : > { %p1196_p1 = por %p1195_p11, %p1194_p8 }
 0x14d   : > { %p1192_p7 = pneg %p1191_p10 }
 0x14f   : > { %p1197_p9 = pnand %p1196_p1, %p1192_p7 }
 0x151   : > { %1200 = shalt.err (!%p1197_p9)
}
 0x152   : > { %944 = dma.vmem_to_hbm [thread:$0]  (%p1454_p5), %s1534_s28, 64, %s1532_s5, %s636_s16   ;;  %v623_v26 = vadd.f32 %v885_v23, %v622_v25  ;;  %v928_v27 = vpop.f32.mrf.mxu0 }
 0x153   : > { %s1596_s26 = scalar_lea.hbm %s1653_s9, %s1514_s20  ;;  %s1684_s24 = scalar_lea.vmem [#allocation13], %s1504_s3 }
 0x154   : > { %v633_v28 = vpack.c.bf16 %v623_v26, %v623_v26  ;;  %v625_v29 = vpop.f32.mrf.mxu0  ;;  %s1201_s23 = scalar_lea.vmem %s689_s25, 64  ;;  %s1305_s28 = smov [#allocation13]  }
 0x155   : > { %p1202_p13 = scmp.ne.s32.totalorder %s689_s25, %s1201_s23  ;;  %s1205_s5 = sshll.u32 %s1305_s28, 4  ;;  %s1206_s5 = int_to_ptr.vmem [resolvable:$false] %s1205_s5 }
 0x156   : > { %634 = vst.msk [vmem:[%s1684_s24] sm:$0xf] %vm629_vm2, %v633_v28  ;;  %v929_v30 = vpop.f32.mrf.mxu0  ;;  %s1207_s16 = scalar_lea.vmem %s1206_s5, 128  ;;  %p1208_p6 = scmp.lt.s32.totalorder %s689_s25, %s1206_s5 }
 0x157   : > { %p1203_p2 = pnand %p1202_p13, %p1454_p5  ;;  %p1209_p12 = scmp.lt.s32.totalorder %s1207_s16, %s1201_s23 }
 0x159   : > { %p1204_p4 = pneg %p1203_p2  ;;  %p1210_p0 = por %p1209_p12, %p1208_p6 }
 0x15b   : > { %p1211_p3 = pnand %p1210_p0, %p1204_p4 }
 0x15d   : > { %1214 = shalt.err (!%p1211_p3)
}
 0x15e   : > { %s1215_s3 = scalar_lea.hbm %s1596_s26, 64  ;;  %s1219_s1 = scalar_lea.hbm %s1653_s9, 128 }
 0x15f   : > { %p1216_p10 = scmp.ne.s32.totalorder %s1596_s26, %s1215_s3  ;;  %p1220_p11 = scmp.lt.s32.totalorder %s1596_s26, %s1653_s9 }
 0x160   : > { %p1221_p1 = scmp.lt.s32.totalorder %s1219_s1, %s1215_s3 }
 0x161   : > { %p1217_p7 = pnand %p1216_p10, %p1454_p5 }
 0x162   : > { %p1222_p9 = por %p1221_p1, %p1220_p11 }
 0x163   : > { %p1218_p8 = pneg %p1217_p7 }
 0x165   : > { %p1223_p13 = pnand %p1222_p9, %p1218_p8 }
 0x167   : > { %1226 = shalt.err (!%p1223_p13)
}
 0x168   : > { %946 = dma.vmem_to_hbm [thread:$0]  (%p1454_p5), %s689_s25, 64, %s1596_s26, %s1545_s15  }
 0x169 PF: > { %s1685_s18 = sld [smem:[#allocation19_spill]]  ;;  %s700_s21 = sand.u32 1, %s1273_s30  }
 0x16a   : > { %p1687_p4 = scmp.ge.s32.totalorder %s1293_s14, 2  ;;  %s701_s0 = scalar_lea.sflag [#allocation4], %s700_s21 }
 0x16f   : > { %p1686_p2 = scmp.ne.s32.totalorder %s1685_s18, 0 }
 0x171   : > { %p965_p6 = pnand %p1687_p4, %p1686_p2 }
 0x173   : > { %p966_p12 = pneg %p965_p6 }
 0x175   : > { %1264 = dma.done.wait (%p966_p12), %s701_s0, 64  }
 0x176   : > { %1266 = vsyncadd (%p966_p12), %s701_s0, 4294967232  ;;  %s1688_s19 = sadd.s32 4294967294, %s1293_s14  }
 0x177   : > { %s709_s24 = sand.u32 1, %s1688_s19  }
 0x178   : > { %s710_s23 = scalar_lea.sflag [#allocation12], %s709_s24 }
 0x179   : > { %1268 = dma.done.wait (%p966_p12), %s710_s23, 128  }
 0x17a   : > { %1270 = vsyncadd (%p966_p12), %s710_s23, 4294967168  ;;  %s31_s14 = sadd.s32 1, %s1293_s14   ;;  %s1689_s22 = sld [smem:[#allocation20_spill]] }
 0x17b   : > { %p28_p5 = scmp.ge.s32.totalorder %s31_s14, 4   ;;  %s1690_s30 = smov %s1277_s10 }
 0x17c   : > { %s1691_s10 = smov %s1281_s11  ;;  %s1692_s11 = smov %s1466_s29 }
 0x17d   : > { %s1693_s12 = smov %s1289_s13  ;;  %30 = sbr.rel (!%p28_p5) target bundleno = 15 (0xf), region = 137 }
 0x180   : > { %s1694_s13 = smov %s1689_s22 }
 0x182   :  { %724 = vsyncpa [#allocation3], 1 }
 0x183   :  { %726 = vsyncpa [#allocation3 + $0x1], 1 }
 0x184   :  { %727 = vsyncpa [#allocation6], 1 }
 0x185   :  { %728 = vsyncpa [#allocation9], 1 }
 0x186   :  { %729 = vsyncpa [#allocation4], 1 }
 0x187   :  { %731 = vsyncpa [#allocation4 + $0x1], 1 }
 0x188   :  { %732 = vsyncpa [#allocation12], 1 }
 0x189   :  { %734 = vsyncpa [#allocation12 + $0x1], 1 }

</bundles_post_ra>
